<compile_context>
chip_gen: v7x
topology: tpu7x:2x2x1
jax: 0.10.0
libtpu: 0.0.40
codegen_flags: <defaults>
</compile_context>

<pallas_src>
import functools

import jax
import jax.numpy as jnp
from jax import lax
from jax.experimental import pallas as pl
from jax.experimental.pallas import tpu as pltpu

_SCALE_OFFSET = 0.01


def _layernorm(x, gamma, eps=1e-5):
    mean = jnp.mean(x, axis=-1, keepdims=True)
    c = x - mean
    var = jnp.mean(c * c, axis=-1, keepdims=True)
    return c * lax.rsqrt(var + eps) * gamma


# ----------------------------------------------------------------------------
# Kernel: grid = (batch, depth).  One grid step = one transformer layer for one
# batch item; project_in runs at d == 0, project_out + Laplace head at the last
# depth step.  The hidden state (T, C) is carried in VMEM scratch.
# ----------------------------------------------------------------------------
def _lm_kernel(
    x_ref,      # (C, T)   f32   latents for this batch item (torch layout)
    pin_ref,    # (C, C)   bf16  project_in (no bias)
    pout_ref,   # (C, C)   bf16  project_out (no bias)
    wh_ref,     # (C, 2C)  bf16  fused [w_mu | w_log_b]
    bh_ref,     # (1, 2C)  f32
    cos_ref,    # (T, Da)  f32   rotary cos, head-tiled
    sin_ref,    # (T, Da)  f32   rotary sin, head-tiled
    rot_ref,    # (Da, Da) bf16  block-diag rotate-half (+/-1 permutation)
    ln1_ref,    # (1, C)   f32   this layer's attn pre-norm gamma
    wqkv_ref,   # (C, 3Da) bf16  fused q|k|v projection (no bias)
    wao_ref,    # (Da, C)  bf16  attention out projection (no bias)
    ln2_ref,    # (1, C)   f32   this layer's ff pre-norm gamma
    ffa_w_ref,  # (C, F)   bf16  GLU value branch
    ffa_b_ref,  # (1, F)   f32
    ffg_w_ref,  # (C, F)   bf16  GLU gate branch (SiLU)
    ffg_b_ref,  # (1, F)   f32
    ffo_w_ref,  # (F, C)   bf16
    ffo_b_ref,  # (1, C)   f32
    out_ref,    # (2C, T)  f32   fused output: rows [0:C]=mu, [C:2C]=log_b
    h_ref,      # (T, C)   f32   hidden-state carry across depth grid steps
    *, depth, heads, dim_heads,
):
    f32 = jnp.float32
    bf16 = jnp.bfloat16

    C, T = x_ref.shape
    Dh = dim_heads
    Da = heads * Dh
    scale = Dh ** -0.5

    d = pl.program_id(1)

    # ---- first depth step: in-kernel (C,T)->(T,C) transpose + project_in ----
    @pl.when(d == 0)
    def _():
        xt = x_ref[...].T                                         # (T, C)
        h_ref[...] = jnp.dot(xt.astype(bf16), pin_ref[...],
                             preferred_element_type=f32)

    # ---- transformer layer d: pre-LN causal attention + residual ------------
    h = h_ref[...]                                                # (T, C) f32

    hn = _layernorm(h, ln1_ref[...])
    qkv = jnp.dot(hn.astype(bf16), wqkv_ref[...], preferred_element_type=f32)
    q = qkv[:, :Da]
    k = qkv[:, Da:2 * Da]
    v = qkv[:, 2 * Da:]

    # RoPE on the full (T, Da) slabs; rotate-half == x @ R (block-diag ±1).
    cos = cos_ref[...]
    sin = sin_ref[...]
    rot = rot_ref[...]
    q = q * cos + jnp.dot(q.astype(bf16), rot, preferred_element_type=f32) * sin
    k = k * cos + jnp.dot(k.astype(bf16), rot, preferred_element_type=f32) * sin
    q = q * scale

    def to_heads(z):                      # (T, Da) -> (heads, T, Dh)
        zt = z.T                                                  # (Da, T)
        zt = zt.reshape(heads, Dh, T)                             # sublane split
        return jnp.transpose(zt, (0, 2, 1))                       # (H, T, Dh)

    qh = to_heads(q).astype(bf16)
    kh = to_heads(k).astype(bf16)
    vh = to_heads(v).astype(bf16)

    # Batched over heads: one score matmul and one context matmul.
    s = jnp.einsum('hqd,hkd->hqk', qh, kh, preferred_element_type=f32)
    causal = (lax.broadcasted_iota(jnp.int32, (heads, T, T), 2)
              <= lax.broadcasted_iota(jnp.int32, (heads, T, T), 1))
    s = jnp.where(causal, s, -1e30)
    s = s - jnp.max(s, axis=-1, keepdims=True)
    p = jnp.exp(s)
    p = p / jnp.sum(p, axis=-1, keepdims=True)       # exact softmax

    o = jnp.einsum('hqk,hkd->hqd', p.astype(bf16), vh,
                   preferred_element_type=f32)                    # (H, T, Dh)
    o = jnp.transpose(o, (0, 2, 1)).reshape(Da, T).T              # (T, Da)
    h = h + jnp.dot(o.astype(bf16), wao_ref[...], preferred_element_type=f32)

    # ---- pre-LN GLU(SiLU) feed-forward + residual ----------------------------
    hn = _layernorm(h, ln2_ref[...])
    hb = hn.astype(bf16)
    pa = jnp.dot(hb, ffa_w_ref[...], preferred_element_type=f32) + ffa_b_ref[...]
    pg = jnp.dot(hb, ffg_w_ref[...], preferred_element_type=f32) + ffg_b_ref[...]
    ff = pa * (pg * jax.nn.sigmoid(pg))              # value * silu(gate)
    h = h + jnp.dot(ff.astype(bf16), ffo_w_ref[...],
                    preferred_element_type=f32) + ffo_b_ref[...]

    h_ref[...] = h

    # ---- last depth step: project_out + Laplace head, torch-layout output ---
    @pl.when(d == depth - 1)
    def _():
        hh = jnp.dot(h_ref[...].astype(bf16), pout_ref[...],
                     preferred_element_type=f32)
        ph = jnp.dot(hh.astype(bf16), wh_ref[...],
                     preferred_element_type=f32) + bh_ref[...]    # (T, 2C)
        mu = ph[:, :C]
        log_b = ph[:, C:]
        b_adj = jnp.maximum(jnp.exp(log_b) - _SCALE_OFFSET, 1e-6)  # clamp(min=1e-6)
        out_ref[:C, :] = mu.T                                      # (C, T)
        out_ref[C:, :] = jnp.log(b_adj).T                          # (C, T)


# ----------------------------------------------------------------------------
# Wrapper: one pallas_call, grid = (batch ["parallel"], depth ["arbitrary"]).
# ----------------------------------------------------------------------------
def laplace_lm_forward(params, latents, *, depth, heads, dim_heads):
    B, C, T = latents.shape

    kern = functools.partial(_lm_kernel, depth=depth, heads=heads,
                             dim_heads=dim_heads)

    def layer_spec(a):       # (depth, r, c): stream layer d's slice
        shape = a.shape[1:]
        return pl.BlockSpec((None,) + shape,
                            lambda b, d, _n=len(shape): (d,) + (0,) * _n)

    def global_spec(a):      # constant block index -> fetched once, resident
        nd = a.ndim
        return pl.BlockSpec(a.shape, lambda b, d, _n=nd: (0,) * _n)

    x_spec = pl.BlockSpec((None, C, T), lambda b, d: (b, 0, 0))
    out_spec = pl.BlockSpec((None, 2 * C, T), lambda b, d: (b, 0, 0))

    global_names = ["proj_in_w", "proj_out_w", "w_head", "b_head",
                    "rope_cos", "rope_sin", "rope_rot"]
    layer_names = ["ln1_g", "wqkv", "w_attn_out", "ln2_g",
                   "ffa_w", "ffa_b", "ffg_w", "ffg_b", "ffo_w", "ffo_b"]
    global_args = [params[n] for n in global_names]
    layer_args = [params[n] for n in layer_names]

    out = pl.pallas_call(
        kern,
        out_shape=jax.ShapeDtypeStruct((B, 2 * C, T), jnp.float32),
        grid=(B, depth),
        in_specs=[x_spec]
                 + [global_spec(a) for a in global_args]
                 + [layer_spec(a) for a in layer_args],
        out_specs=out_spec,
        scratch_shapes=[pltpu.VMEM((T, C), jnp.float32)],   # hidden-state carry
        compiler_params=pltpu.CompilerParams(
            dimension_semantics=("parallel", "arbitrary"),
            vmem_limit_bytes=32 * 1024 * 1024),
    )(latents.astype(jnp.float32), *global_args, *layer_args)

    # torch layout already: (B, 2C, T) -> mu, log_b each (B, C, T)
    return out[:, :C, :], out[:, C:, :]


# ----------------------------------------------------------------------------
# Parameter construction (matmul weights pre-cast to bf16, fused layouts)
# ----------------------------------------------------------------------------
def init_params(key, dim, depth, heads, dim_heads, ff_mult, seq_len):
    inner = dim * ff_mult
    d_attn = heads * dim_heads
    bf16 = jnp.bfloat16
    f32 = jnp.float32

    def nrm(k, shape, scale):
        return (scale * jax.random.normal(k, shape)).astype(f32)

    keys = iter(jax.random.split(key, 8 + depth * 8))

    proj_in_w = nrm(next(keys), (dim, dim), dim ** -0.5)
    proj_out_w = nrm(next(keys), (dim, dim), dim ** -0.5)

    ln1_g, wqkv, w_attn_out, ln2_g = [], [], [], []
    ffa_w, ffa_b, ffg_w, ffg_b, ffo_w, ffo_b = [], [], [], [], [], []
    for _ in range(depth):
        wq = nrm(next(keys), (dim, d_attn), dim ** -0.5)
        wk = nrm(next(keys), (dim, d_attn), dim ** -0.5)
        wv = nrm(next(keys), (dim, d_attn), dim ** -0.5)
        wo = nrm(next(keys), (d_attn, dim), d_attn ** -0.5)
        ff_wi = nrm(next(keys), (dim, 2 * inner), dim ** -0.5)
        ff_wo = nrm(next(keys), (inner, dim), inner ** -0.5)

        ln1_g.append(jnp.ones((1, dim), f32))
        ln2_g.append(jnp.ones((1, dim), f32))
        wqkv.append(jnp.concatenate([wq, wk, wv], axis=1))   # fused q|k|v
        w_attn_out.append(wo)
        ffa_w.append(ff_wi[:, :inner])                       # GLU value branch
        ffg_w.append(ff_wi[:, inner:])                       # GLU gate branch
        ffa_b.append(jnp.zeros((1, inner), f32))
        ffg_b.append(jnp.zeros((1, inner), f32))
        ffo_w.append(ff_wo)
        ffo_b.append(jnp.zeros((1, dim), f32))

    # nn.Linear(embed_dim, dim*2): p.view(B,T,C,2) interleaves (mu, log_b);
    # regroup interleaved columns into a contiguous fused [w_mu | w_log_b].
    w_proj = nrm(next(keys), (dim, 2 * dim), dim ** -0.5)
    b_proj = nrm(next(keys), (2 * dim,), 0.02)
    w_head = jnp.concatenate([w_proj[:, 0::2], w_proj[:, 1::2]], axis=1)
    b_head = jnp.concatenate([b_proj[0::2], b_proj[1::2]]).reshape(1, 2 * dim)

    # Rotary tables: interleaved-pairs convention, tiled across heads (T, Da).
    half = dim_heads // 2
    inv_freq = 1.0 / (10000.0 ** (jnp.arange(half, dtype=f32) / half))
    ang = jnp.arange(seq_len, dtype=f32)[:, None] * inv_freq[None, :]   # (T, half)
    cos_dh = jnp.repeat(jnp.cos(ang), 2, axis=-1)                       # (T, Dh)
    sin_dh = jnp.repeat(jnp.sin(ang), 2, axis=-1)
    rope_cos = jnp.tile(cos_dh, (1, heads))                             # (T, Da)
    rope_sin = jnp.tile(sin_dh, (1, heads))

    # rotate_half (interleaved) as a ±1 permutation matrix, block-diag / heads.
    r = jnp.zeros((dim_heads, dim_heads), f32)
    idx = jnp.arange(half)
    r = r.at[2 * idx + 1, 2 * idx].set(-1.0)   # out[2i]   = -x[2i+1]
    r = r.at[2 * idx, 2 * idx + 1].set(1.0)    # out[2i+1] =  x[2i]
    rope_rot = jnp.kron(jnp.eye(heads, dtype=f32), r).astype(bf16)

    stk = lambda xs: jnp.stack(xs, axis=0)
    return {
        # MXU operands in bf16 (f32 accumulation happens in-kernel)
        "proj_in_w": proj_in_w.astype(bf16),
        "proj_out_w": proj_out_w.astype(bf16),
        "w_head": w_head.astype(bf16),
        "wqkv": stk(wqkv).astype(bf16),
        "w_attn_out": stk(w_attn_out).astype(bf16),
        "ffa_w": stk(ffa_w).astype(bf16),
        "ffg_w": stk(ffg_w).astype(bf16),
        "ffo_w": stk(ffo_w).astype(bf16),
        "rope_rot": rope_rot,
        # LN gammas, biases, rotary tables stay f32 (VPU/EUP math)
        "ln1_g": stk(ln1_g),
        "ln2_g": stk(ln2_g),
        "ffa_b": stk(ffa_b),
        "ffg_b": stk(ffg_b),
        "ffo_b": stk(ffo_b),
        "b_head": b_head,
        "rope_cos": rope_cos,
        "rope_sin": rope_sin,
    }


# ----------------------------------------------------------------------------
# Main
# ----------------------------------------------------------------------------
if __name__ == "__main__":
    B, C, T = 2, 16, 16          # latents: (batch, channels=dim, time)
    depth, heads, dim_heads, ff_mult = 2, 2, 8, 4

    key = jax.random.PRNGKey(0)
    k_param, k_data = jax.random.split(key)
    params = init_params(k_param, C, depth, heads, dim_heads, ff_mult, T)
    latents = jax.random.normal(k_data, (B, C, T), dtype=jnp.float32)

    fwd = jax.jit(functools.partial(
        laplace_lm_forward, depth=depth, heads=heads, dim_heads=dim_heads))
    mu, log_b = fwd(params, latents)
    jax.block_until_ready((mu, log_b))

    assert mu.shape == (B, C, T) and log_b.shape == (B, C, T)
    assert mu.dtype == jnp.float32 and log_b.dtype == jnp.float32
    assert bool(jnp.all(jnp.isfinite(mu))) and bool(jnp.all(jnp.isfinite(log_b)))
    print("KERNEL_OK")
</pallas_src>

<mosaic_0001>
module attributes {stable_mosaic.version = 11 : i64} {
  func.func @_lm_kernel(%arg0: i32, %arg1: i32, %arg2: memref<1x16x16xf32, #tpu.memory_space<vmem>>, %arg3: memref<16x16xbf16, #tpu.memory_space<vmem>>, %arg4: memref<16x16xbf16, #tpu.memory_space<vmem>>, %arg5: memref<16x32xbf16, #tpu.memory_space<vmem>>, %arg6: memref<1x32xf32, #tpu.memory_space<vmem>>, %arg7: memref<16x16xf32, #tpu.memory_space<vmem>>, %arg8: memref<16x16xf32, #tpu.memory_space<vmem>>, %arg9: memref<16x16xbf16, #tpu.memory_space<vmem>>, %arg10: memref<1x1x16xf32, #tpu.memory_space<vmem>>, %arg11: memref<1x16x48xbf16, #tpu.memory_space<vmem>>, %arg12: memref<1x16x16xbf16, #tpu.memory_space<vmem>>, %arg13: memref<1x1x16xf32, #tpu.memory_space<vmem>>, %arg14: memref<1x16x64xbf16, #tpu.memory_space<vmem>>, %arg15: memref<1x1x64xf32, #tpu.memory_space<vmem>>, %arg16: memref<1x16x64xbf16, #tpu.memory_space<vmem>>, %arg17: memref<1x1x64xf32, #tpu.memory_space<vmem>>, %arg18: memref<1x64x16xbf16, #tpu.memory_space<vmem>>, %arg19: memref<1x1x16xf32, #tpu.memory_space<vmem>>, %arg20: memref<1x32x16xf32, #tpu.memory_space<vmem>>, %arg21: memref<16x16xf32, #tpu.memory_space<vmem>>) attributes {dimension_semantics = [#tpu.dimension_semantics<parallel>, #tpu.dimension_semantics<arbitrary>], iteration_bounds = array<i64: 2, 2>, scalar_prefetch = 0 : i64, scratch_operands = 1 : i64, tpu.core_type = #tpu.core_type<tc>, window_params = [{transform_indices = @transform_0, window_bounds = array<i64: 1, 16, 16>}, {pipeline_mode = #tpu.pipeline_mode<synchronous>, transform_indices = @transform_1, window_bounds = array<i64: 16, 16>}, {pipeline_mode = #tpu.pipeline_mode<synchronous>, transform_indices = @transform_2, window_bounds = array<i64: 16, 16>}, {pipeline_mode = #tpu.pipeline_mode<synchronous>, transform_indices = @transform_3, window_bounds = array<i64: 16, 32>}, {pipeline_mode = #tpu.pipeline_mode<synchronous>, transform_indices = @transform_4, window_bounds = array<i64: 1, 32>}, {pipeline_mode = #tpu.pipeline_mode<synchronous>, transform_indices = @transform_5, window_bounds = array<i64: 16, 16>}, {pipeline_mode = #tpu.pipeline_mode<synchronous>, transform_indices = @transform_6, window_bounds = array<i64: 16, 16>}, {pipeline_mode = #tpu.pipeline_mode<synchronous>, transform_indices = @transform_7, window_bounds = array<i64: 16, 16>}, {transform_indices = @transform_8, window_bounds = array<i64: 1, 1, 16>}, {transform_indices = @transform_9, window_bounds = array<i64: 1, 16, 48>}, {transform_indices = @transform_10, window_bounds = array<i64: 1, 16, 16>}, {transform_indices = @transform_11, window_bounds = array<i64: 1, 1, 16>}, {transform_indices = @transform_12, window_bounds = array<i64: 1, 16, 64>}, {transform_indices = @transform_13, window_bounds = array<i64: 1, 1, 64>}, {transform_indices = @transform_14, window_bounds = array<i64: 1, 16, 64>}, {transform_indices = @transform_15, window_bounds = array<i64: 1, 1, 64>}, {transform_indices = @transform_16, window_bounds = array<i64: 1, 64, 16>}, {transform_indices = @transform_17, window_bounds = array<i64: 1, 1, 16>}, {transform_indices = @transform_18, window_bounds = array<i64: 1, 32, 16>}]} {
    %c0_i32 = arith.constant 0 : i32
    %0 = arith.cmpi eq, %arg1, %c0_i32 : i32
    %1 = arith.extui %0 : i1 to i32
    %c0_i32_0 = arith.constant 0 : i32
    %2 = arith.cmpi ne, %1, %c0_i32_0 : i32
    scf.if %2 {
      %c0_64 = arith.constant 0 : index
      %c0_65 = arith.constant 0 : index
      %c0_66 = arith.constant 0 : index
      %138 = vector.load %arg2[%c0_64, %c0_65, %c0_66] : memref<1x16x16xf32, #tpu.memory_space<vmem>>, vector<1x16x16xf32>
      %139 = vector.shape_cast %138 : vector<1x16x16xf32> to vector<16x16xf32>
      %140 = tpu.transpose %139, [1, 0] : vector<16x16xf32> -> vector<16x16xf32>
      %141 = arith.truncf %140 : vector<16x16xf32> to vector<16x16xbf16>
      %c0_67 = arith.constant 0 : index
      %c0_68 = arith.constant 0 : index
      %142 = vector.load %arg3[%c0_67, %c0_68] : memref<16x16xbf16, #tpu.memory_space<vmem>>, vector<16x16xbf16>
      %cst_69 = arith.constant dense<0.000000e+00> : vector<16x16xf32>
      %143 = tpu.matmul %141, %142, %cst_69 {dimension_numbers = #tpu.dot_dimension_numbers<[1], [0], [0], [1], [0, 0, 1, 1], [], []>} : vector<16x16xbf16>, vector<16x16xbf16>, vector<16x16xf32> -> vector<16x16xf32>
      %c0_70 = arith.constant 0 : index
      %c0_71 = arith.constant 0 : index
      %144 = vector.load %arg21[%c0_70, %c0_71] : memref<16x16xf32, #tpu.memory_space<vmem>>, vector<16x16xf32>
      tpu.vector_store %arg21[%c0_70, %c0_71], %143 {strides = array<i32>} : memref<16x16xf32, #tpu.memory_space<vmem>>, vector<16x16xf32>,
    } else {
    }
    %c0 = arith.constant 0 : index
    %c0_1 = arith.constant 0 : index
    %3 = vector.load %arg21[%c0, %c0_1] : memref<16x16xf32, #tpu.memory_space<vmem>>, vector<16x16xf32>
    %c0_2 = arith.constant 0 : index
    %c0_3 = arith.constant 0 : index
    %c0_4 = arith.constant 0 : index
    %4 = vector.load %arg10[%c0_2, %c0_3, %c0_4] : memref<1x1x16xf32, #tpu.memory_space<vmem>>, vector<1x1x16xf32>
    %5 = vector.shape_cast %4 : vector<1x1x16xf32> to vector<1x16xf32>
    %cst = arith.constant dense<0.000000e+00> : vector<16xf32>
    %6 = vector.multi_reduction <add>, %3, %cst [1] : vector<16x16xf32> to vector<16xf32>
    %7 = vector.shape_cast %6 : vector<16xf32> to vector<16x1xf32>
    %cst_5 = arith.constant 1.600000e+01 : f32
    %8 = vector.broadcast %cst_5 : f32 to vector<16x1xf32>
    %9 = arith.divf %7, %8 : vector<16x1xf32>
    %10 = vector.broadcast %9 : vector<16x1xf32> to vector<16x16xf32>
    %11 = arith.subf %3, %10 : vector<16x16xf32>
    %12 = arith.mulf %11, %11 : vector<16x16xf32>
    %cst_6 = arith.constant dense<0.000000e+00> : vector<16xf32>
    %13 = vector.multi_reduction <add>, %12, %cst_6 [1] : vector<16x16xf32> to vector<16xf32>
    %14 = vector.shape_cast %13 : vector<16xf32> to vector<16x1xf32>
    %cst_7 = arith.constant 1.600000e+01 : f32
    %15 = vector.broadcast %cst_7 : f32 to vector<16x1xf32>
    %16 = arith.divf %14, %15 : vector<16x1xf32>
    %cst_8 = arith.constant 9.99999974E-6 : f32
    %17 = vector.broadcast %cst_8 : f32 to vector<16x1xf32>
    %18 = arith.addf %16, %17 : vector<16x1xf32>
    %19 = math.rsqrt %18 : vector<16x1xf32>
    %20 = vector.broadcast %19 : vector<16x1xf32> to vector<16x16xf32>
    %21 = arith.mulf %11, %20 : vector<16x16xf32>
    %22 = vector.broadcast %5 : vector<1x16xf32> to vector<16x16xf32>
    %23 = arith.mulf %21, %22 : vector<16x16xf32>
    %24 = arith.truncf %23 : vector<16x16xf32> to vector<16x16xbf16>
    %c0_9 = arith.constant 0 : index
    %c0_10 = arith.constant 0 : index
    %c0_11 = arith.constant 0 : index
    %25 = vector.load %arg11[%c0_9, %c0_10, %c0_11] : memref<1x16x48xbf16, #tpu.memory_space<vmem>>, vector<1x16x48xbf16>
    %26 = vector.shape_cast %25 : vector<1x16x48xbf16> to vector<16x48xbf16>
    %cst_12 = arith.constant dense<0.000000e+00> : vector<16x48xf32>
    %27 = tpu.matmul %24, %26, %cst_12 {dimension_numbers = #tpu.dot_dimension_numbers<[1], [0], [0], [1], [0, 0, 1, 1], [], []>} : vector<16x16xbf16>, vector<16x48xbf16>, vector<16x48xf32> -> vector<16x48xf32>
    %28 = vector.extract_strided_slice %27 {offsets = [0, 0], sizes = [16, 16], strides = [1, 1]} : vector<16x48xf32> to vector<16x16xf32>
    %29 = vector.extract_strided_slice %27 {offsets = [0, 16], sizes = [16, 16], strides = [1, 1]} : vector<16x48xf32> to vector<16x16xf32>
    %30 = vector.extract_strided_slice %27 {offsets = [0, 32], sizes = [16, 16], strides = [1, 1]} : vector<16x48xf32> to vector<16x16xf32>
    %c0_13 = arith.constant 0 : index
    %c0_14 = arith.constant 0 : index
    %31 = vector.load %arg7[%c0_13, %c0_14] : memref<16x16xf32, #tpu.memory_space<vmem>>, vector<16x16xf32>
    %c0_15 = arith.constant 0 : index
    %c0_16 = arith.constant 0 : index
    %32 = vector.load %arg8[%c0_15, %c0_16] : memref<16x16xf32, #tpu.memory_space<vmem>>, vector<16x16xf32>
    %c0_17 = arith.constant 0 : index
    %c0_18 = arith.constant 0 : index
    %33 = vector.load %arg9[%c0_17, %c0_18] : memref<16x16xbf16, #tpu.memory_space<vmem>>, vector<16x16xbf16>
    %34 = arith.mulf %28, %31 : vector<16x16xf32>
    %35 = arith.truncf %28 : vector<16x16xf32> to vector<16x16xbf16>
    %cst_19 = arith.constant dense<0.000000e+00> : vector<16x16xf32>
    %36 = tpu.matmul %35, %33, %cst_19 {dimension_numbers = #tpu.dot_dimension_numbers<[1], [0], [0], [1], [0, 0, 1, 1], [], []>} : vector<16x16xbf16>, vector<16x16xbf16>, vector<16x16xf32> -> vector<16x16xf32>
    %37 = arith.mulf %36, %32 : vector<16x16xf32>
    %38 = arith.addf %34, %37 : vector<16x16xf32>
    %39 = arith.mulf %29, %31 : vector<16x16xf32>
    %40 = arith.truncf %29 : vector<16x16xf32> to vector<16x16xbf16>
    %cst_20 = arith.constant dense<0.000000e+00> : vector<16x16xf32>
    %41 = tpu.matmul %40, %33, %cst_20 {dimension_numbers = #tpu.dot_dimension_numbers<[1], [0], [0], [1], [0, 0, 1, 1], [], []>} : vector<16x16xbf16>, vector<16x16xbf16>, vector<16x16xf32> -> vector<16x16xf32>
    %42 = arith.mulf %41, %32 : vector<16x16xf32>
    %43 = arith.addf %39, %42 : vector<16x16xf32>
    %cst_21 = arith.constant 0.353553385 : f32
    %44 = vector.broadcast %cst_21 : f32 to vector<16x16xf32>
    %45 = arith.mulf %38, %44 : vector<16x16xf32>
    %46 = tpu.transpose %45, [1, 0] : vector<16x16xf32> -> vector<16x16xf32>
    %47 = vector.shape_cast %46 : vector<16x16xf32> to vector<2x8x16xf32>
    %48 = tpu.transpose %47, [0, 2, 1] : vector<2x8x16xf32> -> vector<2x16x8xf32>
    %49 = arith.truncf %48 : vector<2x16x8xf32> to vector<2x16x8xbf16>
    %50 = tpu.transpose %43, [1, 0] : vector<16x16xf32> -> vector<16x16xf32>
    %51 = vector.shape_cast %50 : vector<16x16xf32> to vector<2x8x16xf32>
    %52 = tpu.transpose %51, [0, 2, 1] : vector<2x8x16xf32> -> vector<2x16x8xf32>
    %53 = arith.truncf %52 : vector<2x16x8xf32> to vector<2x16x8xbf16>
    %54 = tpu.transpose %30, [1, 0] : vector<16x16xf32> -> vector<16x16xf32>
    %55 = vector.shape_cast %54 : vector<16x16xf32> to vector<2x8x16xf32>
    %56 = tpu.transpose %55, [0, 2, 1] : vector<2x8x16xf32> -> vector<2x16x8xf32>
    %57 = arith.truncf %56 : vector<2x16x8xf32> to vector<2x16x8xbf16>
    "tpu.trace_start"() <{level = 10 : i32, message = "hqd,hkd->hqk"}> : () -> ()
    %cst_22 = arith.constant dense<0.000000e+00> : vector<2x16x16xf32>
    %58 = tpu.matmul %49, %53, %cst_22 {dimension_numbers = #tpu.dot_dimension_numbers<[2], [2], [1], [1], [0, 0, 0, 1, 1, 1], [0], [0]>} : vector<2x16x8xbf16>, vector<2x16x8xbf16>, vector<2x16x16xf32> -> vector<2x16x16xf32>
    "tpu.trace_stop"() : () -> ()
    %59 = tpu.iota {dimensions = array<i32: 2>} : vector<2x16x16xi32>
    %60 = tpu.iota {dimensions = array<i32: 1>} : vector<2x16x16xi32>
    %61 = arith.cmpi sle, %59, %60 : vector<2x16x16xi32>
    %cst_23 = arith.constant -1.000000e+30 : f32
    %62 = vector.broadcast %cst_23 : f32 to vector<2x16x16xf32>
    %63 = arith.select %61, %58, %62 : vector<2x16x16xi1>, vector<2x16x16xf32>
    %cst_24 = arith.constant dense<0xFF800000> : vector<2x16xf32>
    %64 = vector.multi_reduction <maximumf>, %63, %cst_24 [2] : vector<2x16x16xf32> to vector<2x16xf32>
    %65 = vector.shape_cast %64 : vector<2x16xf32> to vector<2x16x1xf32>
    %66 = vector.broadcast %65 : vector<2x16x1xf32> to vector<2x16x16xf32>
    %67 = arith.subf %63, %66 : vector<2x16x16xf32>
    %68 = math.exp %67 : vector<2x16x16xf32>
    %cst_25 = arith.constant dense<0.000000e+00> : vector<2x16xf32>
    %69 = vector.multi_reduction <add>, %68, %cst_25 [2] : vector<2x16x16xf32> to vector<2x16xf32>
    %70 = vector.shape_cast %69 : vector<2x16xf32> to vector<2x16x1xf32>
    %71 = vector.broadcast %70 : vector<2x16x1xf32> to vector<2x16x16xf32>
    %72 = arith.divf %68, %71 : vector<2x16x16xf32>
    %73 = arith.truncf %72 : vector<2x16x16xf32> to vector<2x16x16xbf16>
    "tpu.trace_start"() <{level = 10 : i32, message = "hqk,hkd->hqd"}> : () -> ()
    %cst_26 = arith.constant dense<0.000000e+00> : vector<2x16x8xf32>
    %74 = tpu.matmul %73, %57, %cst_26 {dimension_numbers = #tpu.dot_dimension_numbers<[2], [1], [1], [2], [0, 0, 0, 1, 1, 2], [0], [0]>} : vector<2x16x16xbf16>, vector<2x16x8xbf16>, vector<2x16x8xf32> -> vector<2x16x8xf32>
    "tpu.trace_stop"() : () -> ()
    %75 = tpu.transpose %74, [0, 2, 1] : vector<2x16x8xf32> -> vector<2x8x16xf32>
    %76 = vector.shape_cast %75 : vector<2x8x16xf32> to vector<16x16xf32>
    %77 = tpu.transpose %76, [1, 0] : vector<16x16xf32> -> vector<16x16xf32>
    %78 = arith.truncf %77 : vector<16x16xf32> to vector<16x16xbf16>
    %c0_27 = arith.constant 0 : index
    %c0_28 = arith.constant 0 : index
    %c0_29 = arith.constant 0 : index
    %79 = vector.load %arg12[%c0_27, %c0_28, %c0_29] : memref<1x16x16xbf16, #tpu.memory_space<vmem>>, vector<1x16x16xbf16>
    %80 = vector.shape_cast %79 : vector<1x16x16xbf16> to vector<16x16xbf16>
    %cst_30 = arith.constant dense<0.000000e+00> : vector<16x16xf32>
    %81 = tpu.matmul %78, %80, %cst_30 {dimension_numbers = #tpu.dot_dimension_numbers<[1], [0], [0], [1], [0, 0, 1, 1], [], []>} : vector<16x16xbf16>, vector<16x16xbf16>, vector<16x16xf32> -> vector<16x16xf32>
    %82 = arith.addf %3, %81 : vector<16x16xf32>
    %c0_31 = arith.constant 0 : index
    %c0_32 = arith.constant 0 : index
    %c0_33 = arith.constant 0 : index
    %83 = vector.load %arg13[%c0_31, %c0_32, %c0_33] : memref<1x1x16xf32, #tpu.memory_space<vmem>>, vector<1x1x16xf32>
    %84 = vector.shape_cast %83 : vector<1x1x16xf32> to vector<1x16xf32>
    %cst_34 = arith.constant dense<0.000000e+00> : vector<16xf32>
    %85 = vector.multi_reduction <add>, %82, %cst_34 [1] : vector<16x16xf32> to vector<16xf32>
    %86 = vector.shape_cast %85 : vector<16xf32> to vector<16x1xf32>
    %cst_35 = arith.constant 1.600000e+01 : f32
    %87 = vector.broadcast %cst_35 : f32 to vector<16x1xf32>
    %88 = arith.divf %86, %87 : vector<16x1xf32>
    %89 = vector.broadcast %88 : vector<16x1xf32> to vector<16x16xf32>
    %90 = arith.subf %82, %89 : vector<16x16xf32>
    %91 = arith.mulf %90, %90 : vector<16x16xf32>
    %cst_36 = arith.constant dense<0.000000e+00> : vector<16xf32>
    %92 = vector.multi_reduction <add>, %91, %cst_36 [1] : vector<16x16xf32> to vector<16xf32>
    %93 = vector.shape_cast %92 : vector<16xf32> to vector<16x1xf32>
    %cst_37 = arith.constant 1.600000e+01 : f32
    %94 = vector.broadcast %cst_37 : f32 to vector<16x1xf32>
    %95 = arith.divf %93, %94 : vector<16x1xf32>
    %cst_38 = arith.constant 9.99999974E-6 : f32
    %96 = vector.broadcast %cst_38 : f32 to vector<16x1xf32>
    %97 = arith.addf %95, %96 : vector<16x1xf32>
    %98 = math.rsqrt %97 : vector<16x1xf32>
    %99 = vector.broadcast %98 : vector<16x1xf32> to vector<16x16xf32>
    %100 = arith.mulf %90, %99 : vector<16x16xf32>
    %101 = vector.broadcast %84 : vector<1x16xf32> to vector<16x16xf32>
    %102 = arith.mulf %100, %101 : vector<16x16xf32>
    %103 = arith.truncf %102 : vector<16x16xf32> to vector<16x16xbf16>
    %c0_39 = arith.constant 0 : index
    %c0_40 = arith.constant 0 : index
    %c0_41 = arith.constant 0 : index
    %104 = vector.load %arg14[%c0_39, %c0_40, %c0_41] : memref<1x16x64xbf16, #tpu.memory_space<vmem>>, vector<1x16x64xbf16>
    %105 = vector.shape_cast %104 : vector<1x16x64xbf16> to vector<16x64xbf16>
    %cst_42 = arith.constant dense<0.000000e+00> : vector<16x64xf32>
    %106 = tpu.matmul %103, %105, %cst_42 {dimension_numbers = #tpu.dot_dimension_numbers<[1], [0], [0], [1], [0, 0, 1, 1], [], []>} : vector<16x16xbf16>, vector<16x64xbf16>, vector<16x64xf32> -> vector<16x64xf32>
    %c0_43 = arith.constant 0 : index
    %c0_44 = arith.constant 0 : index
    %c0_45 = arith.constant 0 : index
    %107 = vector.load %arg15[%c0_43, %c0_44, %c0_45] : memref<1x1x64xf32, #tpu.memory_space<vmem>>, vector<1x1x64xf32>
    %108 = vector.shape_cast %107 : vector<1x1x64xf32> to vector<1x64xf32>
    %109 = vector.broadcast %108 : vector<1x64xf32> to vector<16x64xf32>
    %110 = arith.addf %106, %109 : vector<16x64xf32>
    %c0_46 = arith.constant 0 : index
    %c0_47 = arith.constant 0 : index
    %c0_48 = arith.constant 0 : index
    %111 = vector.load %arg16[%c0_46, %c0_47, %c0_48] : memref<1x16x64xbf16, #tpu.memory_space<vmem>>, vector<1x16x64xbf16>
    %112 = vector.shape_cast %111 : vector<1x16x64xbf16> to vector<16x64xbf16>
    %cst_49 = arith.constant dense<0.000000e+00> : vector<16x64xf32>
    %113 = tpu.matmul %103, %112, %cst_49 {dimension_numbers = #tpu.dot_dimension_numbers<[1], [0], [0], [1], [0, 0, 1, 1], [], []>} : vector<16x16xbf16>, vector<16x64xbf16>, vector<16x64xf32> -> vector<16x64xf32>
    %c0_50 = arith.constant 0 : index
    %c0_51 = arith.constant 0 : index
    %c0_52 = arith.constant 0 : index
    %114 = vector.load %arg17[%c0_50, %c0_51, %c0_52] : memref<1x1x64xf32, #tpu.memory_space<vmem>>, vector<1x1x64xf32>
    %115 = vector.shape_cast %114 : vector<1x1x64xf32> to vector<1x64xf32>
    %116 = vector.broadcast %115 : vector<1x64xf32> to vector<16x64xf32>
    %117 = arith.addf %113, %116 : vector<16x64xf32>
    %118 = arith.negf %117 : vector<16x64xf32>
    %119 = math.exp %118 : vector<16x64xf32>
    %cst_53 = arith.constant 1.000000e+00 : f32
    %120 = vector.broadcast %cst_53 : f32 to vector<16x64xf32>
    %121 = arith.addf %120, %119 : vector<16x64xf32>
    %122 = arith.divf %120, %121 : vector<16x64xf32>
    %123 = arith.mulf %117, %122 : vector<16x64xf32>
    %124 = arith.mulf %110, %123 : vector<16x64xf32>
    %125 = arith.truncf %124 : vector<16x64xf32> to vector<16x64xbf16>
    %c0_54 = arith.constant 0 : index
    %c0_55 = arith.constant 0 : index
    %c0_56 = arith.constant 0 : index
    %126 = vector.load %arg18[%c0_54, %c0_55, %c0_56] : memref<1x64x16xbf16, #tpu.memory_space<vmem>>, vector<1x64x16xbf16>
    %127 = vector.shape_cast %126 : vector<1x64x16xbf16> to vector<64x16xbf16>
    %cst_57 = arith.constant dense<0.000000e+00> : vector<16x16xf32>
    %128 = tpu.matmul %125, %127, %cst_57 {dimension_numbers = #tpu.dot_dimension_numbers<[1], [0], [0], [1], [0, 0, 1, 1], [], []>} : vector<16x64xbf16>, vector<64x16xbf16>, vector<16x16xf32> -> vector<16x16xf32>
    %129 = arith.addf %82, %128 : vector<16x16xf32>
    %c0_58 = arith.constant 0 : index
    %c0_59 = arith.constant 0 : index
    %c0_60 = arith.constant 0 : index
    %130 = vector.load %arg19[%c0_58, %c0_59, %c0_60] : memref<1x1x16xf32, #tpu.memory_space<vmem>>, vector<1x1x16xf32>
    %131 = vector.shape_cast %130 : vector<1x1x16xf32> to vector<1x16xf32>
    %132 = vector.broadcast %131 : vector<1x16xf32> to vector<16x16xf32>
    %133 = arith.addf %129, %132 : vector<16x16xf32>
    %c0_61 = arith.constant 0 : index
    %c0_62 = arith.constant 0 : index
    %134 = vector.load %arg21[%c0_61, %c0_62] : memref<16x16xf32, #tpu.memory_space<vmem>>, vector<16x16xf32>
    tpu.vector_store %arg21[%c0_61, %c0_62], %133 {strides = array<i32>} : memref<16x16xf32, #tpu.memory_space<vmem>>, vector<16x16xf32>,
    %c1_i32 = arith.constant 1 : i32
    %135 = arith.cmpi eq, %arg1, %c1_i32 : i32
    %136 = arith.extui %135 : i1 to i32
    %c0_i32_63 = arith.constant 0 : i32
    %137 = arith.cmpi ne, %136, %c0_i32_63 : i32
    scf.if %137 {
      %c0_64 = arith.constant 0 : index
      %c0_65 = arith.constant 0 : index
      %138 = vector.load %arg21[%c0_64, %c0_65] : memref<16x16xf32, #tpu.memory_space<vmem>>, vector<16x16xf32>
      %139 = arith.truncf %138 : vector<16x16xf32> to vector<16x16xbf16>
      %c0_66 = arith.constant 0 : index
      %c0_67 = arith.constant 0 : index
      %140 = vector.load %arg4[%c0_66, %c0_67] : memref<16x16xbf16, #tpu.memory_space<vmem>>, vector<16x16xbf16>
      %cst_68 = arith.constant dense<0.000000e+00> : vector<16x16xf32>
      %141 = tpu.matmul %139, %140, %cst_68 {dimension_numbers = #tpu.dot_dimension_numbers<[1], [0], [0], [1], [0, 0, 1, 1], [], []>} : vector<16x16xbf16>, vector<16x16xbf16>, vector<16x16xf32> -> vector<16x16xf32>
      %142 = arith.truncf %141 : vector<16x16xf32> to vector<16x16xbf16>
      %c0_69 = arith.constant 0 : index
      %c0_70 = arith.constant 0 : index
      %143 = vector.load %arg5[%c0_69, %c0_70] : memref<16x32xbf16, #tpu.memory_space<vmem>>, vector<16x32xbf16>
      %cst_71 = arith.constant dense<0.000000e+00> : vector<16x32xf32>
      %144 = tpu.matmul %142, %143, %cst_71 {dimension_numbers = #tpu.dot_dimension_numbers<[1], [0], [0], [1], [0, 0, 1, 1], [], []>} : vector<16x16xbf16>, vector<16x32xbf16>, vector<16x32xf32> -> vector<16x32xf32>
      %c0_72 = arith.constant 0 : index
      %c0_73 = arith.constant 0 : index
      %145 = vector.load %arg6[%c0_72, %c0_73] : memref<1x32xf32, #tpu.memory_space<vmem>>, vector<1x32xf32>
      %146 = vector.broadcast %145 : vector<1x32xf32> to vector<16x32xf32>
      %147 = arith.addf %144, %146 : vector<16x32xf32>
      %148 = vector.extract_strided_slice %147 {offsets = [0, 0], sizes = [16, 16], strides = [1, 1]} : vector<16x32xf32> to vector<16x16xf32>
      %149 = vector.extract_strided_slice %147 {offsets = [0, 16], sizes = [16, 16], strides = [1, 1]} : vector<16x32xf32> to vector<16x16xf32>
      %150 = math.exp %149 : vector<16x16xf32>
      %cst_74 = arith.constant 0.00999999977 : f32
      %151 = vector.broadcast %cst_74 : f32 to vector<16x16xf32>
      %152 = arith.subf %150, %151 : vector<16x16xf32>
      %cst_75 = arith.constant 9.99999997E-7 : f32
      %153 = vector.broadcast %cst_75 : f32 to vector<16x16xf32>
      %154 = arith.maximumf %152, %153 : vector<16x16xf32>
      %155 = tpu.transpose %148, [1, 0] : vector<16x16xf32> -> vector<16x16xf32>
      %c0_76 = arith.constant 0 : index
      %c0_77 = arith.constant 0 : index
      %c0_78 = arith.constant 0 : index
      %156 = vector.load %arg20[%c0_76, %c0_77, %c0_78] : memref<1x32x16xf32, #tpu.memory_space<vmem>>, vector<1x16x16xf32>
      %157 = vector.shape_cast %156 : vector<1x16x16xf32> to vector<16x16xf32>
      %158 = vector.shape_cast %155 : vector<16x16xf32> to vector<1x16x16xf32>
      tpu.vector_store %arg20[%c0_76, %c0_77, %c0_78], %158 {strides = array<i32>} : memref<1x32x16xf32, #tpu.memory_space<vmem>>, vector<1x16x16xf32>,
      %159 = math.log %154 : vector<16x16xf32>
      %160 = tpu.transpose %159, [1, 0] : vector<16x16xf32> -> vector<16x16xf32>
      %c0_79 = arith.constant 0 : index
      %c16 = arith.constant 16 : index
      %c0_80 = arith.constant 0 : index
      %161 = vector.load %arg20[%c0_79, %c16, %c0_80] : memref<1x32x16xf32, #tpu.memory_space<vmem>>, vector<1x16x16xf32>
      %162 = vector.shape_cast %161 : vector<1x16x16xf32> to vector<16x16xf32>
      %163 = vector.shape_cast %160 : vector<16x16xf32> to vector<1x16x16xf32>
      tpu.vector_store %arg20[%c0_79, %c16, %c0_80], %163 {strides = array<i32>} : memref<1x32x16xf32, #tpu.memory_space<vmem>>, vector<1x16x16xf32>,
    } else {
    }
    return
  }
  func.func @transform_0(%arg0: i32, %arg1: i32) -> (i32, i32, i32) {
    %c0_i32 = arith.constant 0 : i32
    %c0_i32_0 = arith.constant 0 : i32
    %c0_i32_1 = arith.constant 0 : i32
    return %arg0, %c0_i32, %c0_i32_0 : i32, i32, i32
  }
  func.func @transform_1(%arg0: i32, %arg1: i32) -> (i32, i32) {
    %c0_i32 = arith.constant 0 : i32
    %c0_i32_0 = arith.constant 0 : i32
    %c0_i32_1 = arith.constant 0 : i32
    return %c0_i32, %c0_i32_0 : i32, i32
  }
  func.func @transform_2(%arg0: i32, %arg1: i32) -> (i32, i32) {
    %c0_i32 = arith.constant 0 : i32
    %c0_i32_0 = arith.constant 0 : i32
    %c0_i32_1 = arith.constant 0 : i32
    return %c0_i32, %c0_i32_0 : i32, i32
  }
  func.func @transform_3(%arg0: i32, %arg1: i32) -> (i32, i32) {
    %c0_i32 = arith.constant 0 : i32
    %c0_i32_0 = arith.constant 0 : i32
    %c0_i32_1 = arith.constant 0 : i32
    return %c0_i32, %c0_i32_0 : i32, i32
  }
  func.func @transform_4(%arg0: i32, %arg1: i32) -> (i32, i32) {
    %c0_i32 = arith.constant 0 : i32
    %c0_i32_0 = arith.constant 0 : i32
    %c0_i32_1 = arith.constant 0 : i32
    return %c0_i32, %c0_i32_0 : i32, i32
  }
  func.func @transform_5(%arg0: i32, %arg1: i32) -> (i32, i32) {
    %c0_i32 = arith.constant 0 : i32
    %c0_i32_0 = arith.constant 0 : i32
    %c0_i32_1 = arith.constant 0 : i32
    return %c0_i32, %c0_i32_0 : i32, i32
  }
  func.func @transform_6(%arg0: i32, %arg1: i32) -> (i32, i32) {
    %c0_i32 = arith.constant 0 : i32
    %c0_i32_0 = arith.constant 0 : i32
    %c0_i32_1 = arith.constant 0 : i32
    return %c0_i32, %c0_i32_0 : i32, i32
  }
  func.func @transform_7(%arg0: i32, %arg1: i32) -> (i32, i32) {
    %c0_i32 = arith.constant 0 : i32
    %c0_i32_0 = arith.constant 0 : i32
    %c0_i32_1 = arith.constant 0 : i32
    return %c0_i32, %c0_i32_0 : i32, i32
  }
  func.func @transform_8(%arg0: i32, %arg1: i32) -> (i32, i32, i32) {
    %c0_i32 = arith.constant 0 : i32
    %c0_i32_0 = arith.constant 0 : i32
    %c0_i32_1 = arith.constant 0 : i32
    return %arg1, %c0_i32, %c0_i32_0 : i32, i32, i32
  }
  func.func @transform_9(%arg0: i32, %arg1: i32) -> (i32, i32, i32) {
    %c0_i32 = arith.constant 0 : i32
    %c0_i32_0 = arith.constant 0 : i32
    %c0_i32_1 = arith.constant 0 : i32
    return %arg1, %c0_i32, %c0_i32_0 : i32, i32, i32
  }
  func.func @transform_10(%arg0: i32, %arg1: i32) -> (i32, i32, i32) {
    %c0_i32 = arith.constant 0 : i32
    %c0_i32_0 = arith.constant 0 : i32
    %c0_i32_1 = arith.constant 0 : i32
    return %arg1, %c0_i32, %c0_i32_0 : i32, i32, i32
  }
  func.func @transform_11(%arg0: i32, %arg1: i32) -> (i32, i32, i32) {
    %c0_i32 = arith.constant 0 : i32
    %c0_i32_0 = arith.constant 0 : i32
    %c0_i32_1 = arith.constant 0 : i32
    return %arg1, %c0_i32, %c0_i32_0 : i32, i32, i32
  }
  func.func @transform_12(%arg0: i32, %arg1: i32) -> (i32, i32, i32) {
    %c0_i32 = arith.constant 0 : i32
    %c0_i32_0 = arith.constant 0 : i32
    %c0_i32_1 = arith.constant 0 : i32
    return %arg1, %c0_i32, %c0_i32_0 : i32, i32, i32
  }
  func.func @transform_13(%arg0: i32, %arg1: i32) -> (i32, i32, i32) {
    %c0_i32 = arith.constant 0 : i32
    %c0_i32_0 = arith.constant 0 : i32
    %c0_i32_1 = arith.constant 0 : i32
    return %arg1, %c0_i32, %c0_i32_0 : i32, i32, i32
  }
  func.func @transform_14(%arg0: i32, %arg1: i32) -> (i32, i32, i32) {
    %c0_i32 = arith.constant 0 : i32
    %c0_i32_0 = arith.constant 0 : i32
    %c0_i32_1 = arith.constant 0 : i32
    return %arg1, %c0_i32, %c0_i32_0 : i32, i32, i32
  }
  func.func @transform_15(%arg0: i32, %arg1: i32) -> (i32, i32, i32) {
    %c0_i32 = arith.constant 0 : i32
    %c0_i32_0 = arith.constant 0 : i32
    %c0_i32_1 = arith.constant 0 : i32
    return %arg1, %c0_i32, %c0_i32_0 : i32, i32, i32
  }
  func.func @transform_16(%arg0: i32, %arg1: i32) -> (i32, i32, i32) {
    %c0_i32 = arith.constant 0 : i32
    %c0_i32_0 = arith.constant 0 : i32
    %c0_i32_1 = arith.constant 0 : i32
    return %arg1, %c0_i32, %c0_i32_0 : i32, i32, i32
  }
  func.func @transform_17(%arg0: i32, %arg1: i32) -> (i32, i32, i32) {
    %c0_i32 = arith.constant 0 : i32
    %c0_i32_0 = arith.constant 0 : i32
    %c0_i32_1 = arith.constant 0 : i32
    return %arg1, %c0_i32, %c0_i32_0 : i32, i32, i32
  }
  func.func @transform_18(%arg0: i32, %arg1: i32) -> (i32, i32, i32) {
    %c0_i32 = arith.constant 0 : i32
    %c0_i32_0 = arith.constant 0 : i32
    %c0_i32_1 = arith.constant 0 : i32
    return %arg0, %c0_i32, %c0_i32_0 : i32, i32, i32
  }
}

</mosaic_0001>

<bundles_post_ra>
// kernel: laplace_lm_forward.1
= control target key start
LH: loop header
LB: loop body
LE: loop exit
PB: predicated region body
PF: predicated region fallthrough
CT: control target
= control target key end

     0   :  { %s4302_s0 = inlined_call_operand.vmem [shape: f32[2,16,16], index: 0, kind: input, shape index: {}]   ;;  %s4303_s1 = inlined_call_operand.hbm [shape: bf16[16,16], index: 1, kind: input, shape index: {}]   ;;  %s4304_s2 = inlined_call_operand.hbm [shape: bf16[16,16], index: 2, kind: input, shape index: {}]   ;;  %s4305_s3 = inlined_call_operand.vmem [shape: bf16[16,32], index: 3, kind: input, shape index: {}]   ;;  %s4306_s4 = inlined_call_operand.hbm [shape: f32[1,32], index: 4, kind: input, shape index: {}]   ;;  %s4307_s5 = inlined_call_operand.vmem [shape: f32[16,16], index: 5, kind: input, shape index: {}]   ;;  %s4308_s6 = inlined_call_operand.vmem [shape: f32[16,16], index: 6, kind: input, shape index: {}]   ;;  %s4309_s7 = inlined_call_operand.hbm [shape: bf16[16,16], index: 7, kind: input, shape index: {}]   ;;  %s4310_s8 = inlined_call_operand.hbm [shape: f32[2,1,16], index: 8, kind: input, shape index: {}]   ;;  %s4311_s9 = inlined_call_operand.vmem [shape: bf16[2,16,48], index: 9, kind: input, shape index: {}]   ;;  %s4312_s10 = inlined_call_operand.vmem [shape: bf16[2,16,16], index: 10, kind: input, shape index: {}]   ;;  %s4313_s11 = inlined_call_operand.hbm [shape: f32[2,1,16], index: 11, kind: input, shape index: {}]   ;;  %s4314_s12 = inlined_call_operand.hbm [shape: bf16[2,16,64], index: 12, kind: input, shape index: {}]   ;;  %s4315_s13 = inlined_call_operand.hbm [shape: f32[2,1,64], index: 13, kind: input, shape index: {}]   ;;  %s4316_s14 = inlined_call_operand.hbm [shape: bf16[2,16,64], index: 14, kind: input, shape index: {}]   ;;  %s4317_s15 = inlined_call_operand.hbm [shape: f32[2,1,64], index: 15, kind: input, shape index: {}]   ;;  %s4318_s16 = inlined_call_operand.vmem [shape: bf16[2,64,16], index: 16, kind: input, shape index: {}]   ;;  %s4319_s17 = inlined_call_operand.hbm [shape: f32[2,1,16], index: 17, kind: input, shape index: {}]   ;;  %s4320_s18 = inlined_call_operand.vmem [shape: f32[2,32,16], index: 18, kind: output, shape index: {}]  }
   0x1   :  { %4358 = sst [smem:[#allocation32_spill]] %s4302_s0 }
   0x2   :  { %4359 = sst [smem:[#allocation33_spill]] %s4303_s1 }
   0x3   :  { %4360 = sst [smem:[#allocation34_spill]] %s4304_s2 }
   0x4   :  { %4361 = sst [smem:[#allocation35_spill]] %s4305_s3 }
   0x5   :  { %4362 = sst [smem:[#allocation36_spill]] %s4306_s4 }
   0x6   :  { %4363 = sst [smem:[#allocation37_spill]] %s4307_s5 }
   0x7   :  { %4364 = sst [smem:[#allocation38_spill]] %s4308_s6 }
   0x8   :  { %4365 = sst [smem:[#allocation39_spill]] %s4309_s7 }
   0x9   :  { %4366 = sst [smem:[#allocation40_spill]] %s4310_s8 }
   0xa   :  { %4367 = sst [smem:[#allocation41_spill]] %s4311_s9 }
   0xb   :  { %4368 = sst [smem:[#allocation42_spill]] %s4312_s10 }
   0xc   :  { %4369 = sst [smem:[#allocation43_spill]] %s4313_s11 }
   0xd   :  { %4370 = sst [smem:[#allocation44_spill]] %s4314_s12 }
   0xe   :  { %4371 = sst [smem:[#allocation45_spill]] %s4318_s16 }
   0xf   :  { %4372 = sst [smem:[#allocation46_spill]] %s4320_s18 }
  0x10   :  { %23 = vsyncpa [#allocation4], 0 }
  0x11   :  { %24 = vsyncpa [#allocation6], 0 }
  0x12   :  { %25 = vsyncpa [#allocation9], 0  ;;  %s3665_s27 = smov 0   ;;  %s3667_s28 = smov 0  }
  0x13   :  { %s3669_s29 = smov 0   ;;  %s3671_s30 = smov 0  }
  0x14   :  { %s3673_s0 = smov 0   ;;  %s3675_s19 = smov 0  }
  0x15   :  { %s3677_s1 = smov 0   ;;  %s3679_s20 = smov 0  }
  0x16 LB: > { %4373 = sst [smem:[#allocation21_spill]] %s3521_s28  ;;  %s4323_s21 = sadd.s32 4294967295, %s3545_s20   ;;  %s3545_s20 = sphi %s3679_s20, %s31_s20   ;;  %s3541_s1 = sphi %s3677_s1, %s4436_s1   ;;  %s3537_s19 = sphi %s3675_s19, %s4438_s19   ;;  %s3533_s0 = sphi %s3673_s0, %s4434_s0   ;;  %s3529_s30 = sphi %s3671_s30, %s4437_s30   ;;  %s3525_s29 = sphi %s3669_s29, %s4433_s29   ;;  %s3521_s28 = sphi %s3667_s28, %s4432_s28   ;;  %s3517_s27 = sphi %s3665_s27, %s4431_s27  }
  0x17   : > { %4374 = sst [smem:[#allocation22_spill]] %s3525_s29  ;;  %p236_p0 = scmp.ne.s32.totalorder %s3521_s28, %s3517_s27 }
  0x18   : > { %4375 = sst [smem:[#allocation23_spill]] %s3529_s30  ;;  %p3707_p1 = scmp.eq.s32.totalorder %s4323_s21, 0 }
  0x19   : > { %4376 = sst [smem:[#allocation24_spill]] %s3533_s0  ;;  %p2692_p2 = scmp.ge.s32.totalorder %s3545_s20, 1 }
  0x1a   : > { %4377 = sst [smem:[#allocation25_spill]] %s3541_s1  ;;  %p507_p3 = scmp.lt.s32.totalorder %s3545_s20, 5 }
  0x1b   : > { %4378 = sst [smem:[#allocation26_spill]] %s3545_s20  ;;  %p3715_p4 = por %p3707_p1, %p236_p0 }
  0x1c   : > { %s4379_s22 = scalar_select %p3707_p1, 1, 0 }
  0x1d   : > { %s4381_s2 = scalar_select %p3715_p4, 1, 0 }
  0x1e   : > { %4380 = sst [smem:[#allocation27_spill]] %s4379_s22  ;;  %p3719_p5 = pnand %p2692_p2, %p507_p3 }
  0x1f   : > { %4382 = sst [smem:[#allocation28_spill]] %s4381_s2  ;;  %s3547_s24 = smov [#allocation3]  }
  0x20   : > { %s4383_s23 = scalar_select %p3719_p5, 1, 0 }
  0x21   : > { %s519_s25 = sshll.u32 %s3547_s24, 4  ;;  %p2924_p6 = pneg %p3719_p5  ;;  %s520_s25 = int_to_ptr.vmem [resolvable:$true] %s519_s25 }
  0x22   : > { %s4385_s3 = sld [smem:[#allocation33_spill]] }
  0x23   : > { %p3727_p7 = pnand %p2924_p6, %p3707_p1 }
  0x25   : > { %s4384_s26 = scalar_select %p3727_p7, 1, 0 }
  0x26   : > { %p3739_p9 = pneg %p3727_p7 }
  0x28   : > { %s3145_s6 = scalar_lea.hbm %s4385_s3, 128 }
  0x29   : > { %p3146_p8 = scmp.ne.s32.totalorder %s4385_s3, %s3145_s6  ;;  %p3152_p12 = scmp.lt.u32.totalorder %s3145_s6, %s4385_s3 }
  0x2a   : > { %s4386_s24 = scalar_select %p3739_p9, 1, 0 }
  0x2b   : > { %p3148_p10 = pnand %p3739_p9, %p3146_p8 }
  0x2d   : > { %p3149_p11 = pneg %p3148_p10 }
  0x2f   : > { %p3154_p13 = pnand %p3152_p12, %p3149_p11 }
  0x31   : > { %3157 = shalt.err (!%p3154_p13)
}
  0x32   : > { %s3158_s21 = scalar_lea.vmem %s520_s25, 128  ;;  %p3166_p6 = scmp.lt.s32.totalorder %s520_s25, %s520_s25 }
  0x33   : > { %p3159_p0 = scmp.ne.s32.totalorder %s520_s25, %s3158_s21  ;;  %p3167_p4 = scmp.lt.s32.totalorder %s3158_s21, %s3158_s21 }
  0x35   : > { %p3161_p2 = pnand %p3159_p0, %p3739_p9  ;;  %p3168_p1 = por %p3167_p4, %p3166_p6 }
  0x37   : > { %p3162_p3 = pneg %p3161_p2 }
  0x39   : > { %p3169_p5 = pnand %p3168_p1, %p3162_p3 }
  0x3b   : > { %3172 = shalt.err (!%p3169_p5)
}
  0x3c   : > { %s4330_s5 = smov 64   ;;  %s4332_s6 = smov 4  }
  0x3d   : > { %2927 = dma.hbm_to_vmem [thread:$0]  (!%p3727_p7), %s4385_s3, 128, %s520_s25, [#allocation4], %s4330_s5, %s4330_s5, %s4332_s6  }
  0x3e   : > { %s40_s18 = sadd.s32 1, %s3537_s19  ;;  %s43_s27 = sadd.s32 1, %s3541_s1 }
  0x3f   : > { %p41_p1 = scmp.ge.s32.totalorder %s40_s18, 2  ;;  %s223_s21 = sadd.s32 1, %s3525_s29 }
  0x40   : > { %p230_p4 = scmp.ne.s32.totalorder %s3525_s29, %s3521_s28  ;;  %p231_p5 = scmp.eq.s32.totalorder %s3545_s20, 0 }
  0x41   : > { %s4440_s18 = smov (%p41_p1, %s40_s18), 0  ;;  %s4442_s27 = smov (!%p41_p1, %s43_s27), %s3541_s1 }
  0x42   : > { %4387 = sst [smem:[#allocation29_spill]] %s4440_s18  ;;  %s220_s9 = ssub.s32 %s3537_s19, %s4440_s18 }
  0x43   : > { %p45_p8 = scmp.ge.s32.totalorder %s4442_s27, 2  ;;  %p221_p10 = scmp.eq.s32.totalorder %s220_s9, 0 }
  0x44   : > { %p232_p11 = por %p231_p5, %p230_p4  ;;  %p2963_p12 = scmp.lt.s32.totalorder %s3545_s20, 4 }
  0x45   : > { %s4444_s27 = smov (%p45_p8, %s4442_s27), 0  ;;  %s587_s10 = sand.u32 1, %s3545_s20  }
  0x46   : > { %4388 = sst [smem:[#allocation30_spill]] %s4444_s27  ;;  %s3777_s16 = sand.u32 1, %s3525_s29  }
  0x47   : > { %s3773_s25 = scalar_select %p221_p10, %s3525_s29, %s223_s21  }
  0x48   : > { %s3780_s5 = sshll.u32 %s3537_s19, 4  ;;  %s590_s6 = scalar_lea.vmem [#allocation10], %s3777_s16 }
  0x49   : > { %4389 = sst [smem:[#allocation31_spill]] %s3773_s25  ;;  %s597_s3 = sshll.u32 %s590_s6, 4  ;;  %s3789_s3 = int_to_ptr.vmem [resolvable:$true] %s597_s3 }
  0x4a   : > { %s4390_s8 = sld [smem:[#allocation40_spill]]  ;;  %p3791_p13 = pnand %p2963_p12, %p232_p11 }
  0x4b   : > { %s4392_s11 = sld [smem:[#allocation43_spill]]  ;;  %s623_s29 = scalar_lea.vmem [#allocation11], %s3777_s16 }
  0x4c   : > { %s4391_s21 = scalar_select %p3791_p13, 1, 0 }
  0x4d   : > { %s630_s1 = sshll.u32 %s623_s29, 4  ;;  %s3804_s18 = scalar_lea.sflag [#allocation4], %s587_s10  ;;  %s3802_s1 = int_to_ptr.vmem [resolvable:$true] %s630_s1 }
  0x4e   : > { %p3810_p2 = pneg %p3791_p13 }
  0x50   : > { %s3787_s9 = scalar_lea.hbm %s4390_s8, %s3780_s5  ;;  %s3178_s2 = scalar_lea.hbm %s4390_s8, 32 }
  0x51   : > { %s3799_s6 = scalar_lea.hbm %s4392_s11, %s3780_s5  ;;  %s3173_s30 = scalar_lea.hbm %s3787_s9, 16 }
  0x52   : > { %p3174_p0 = scmp.ne.s32.totalorder %s3787_s9, %s3173_s30  ;;  %p3179_p1 = scmp.lt.u32.totalorder %s3787_s9, %s4390_s8 }
  0x53   : > { %s4393_s0 = scalar_select %p3810_p2, 1, 0 }
  0x54   : > { %p3176_p3 = pnand %p3810_p2, %p3174_p0  ;;  %p3180_p4 = scmp.lt.u32.totalorder %s3178_s2, %s3173_s30 }
  0x55   : > { %p3182_p8 = scmp.lt.u32.totalorder %s3173_s30, %s3787_s9 }
  0x56   : > { %p3177_p6 = pneg %p3176_p3  ;;  %p3181_p5 = por %p3180_p4, %p3179_p1 }
  0x58   : > { %p3183_p10 = por %p3182_p8, %p3181_p5 }
  0x5a   : > { %p3184_p11 = pnand %p3183_p10, %p3177_p6 }
  0x5c   : > { %3187 = shalt.err (!%p3184_p11)
}
  0x5d   : > { %s3188_s10 = scalar_lea.vmem %s3789_s3, 16  ;;  %s3550_s27 = smov [#allocation10]  }
  0x5e   : > { %p3189_p12 = scmp.ne.s32.totalorder %s3789_s3, %s3188_s10  ;;  %s3193_s25 = sshll.u32 %s3550_s27, 4  ;;  %s3194_s25 = int_to_ptr.vmem [resolvable:$false] %s3193_s25 }
  0x5f   : > { %s3195_s28 = scalar_lea.vmem %s3194_s25, 32  ;;  %p3196_p7 = scmp.lt.s32.totalorder %s3789_s3, %s3194_s25 }
  0x60   : > { %p3191_p0 = pnand %p3189_p12, %p3810_p2  ;;  %p3197_p9 = scmp.lt.s32.totalorder %s3195_s28, %s3188_s10 }
  0x62   : > { %p3192_p3 = pneg %p3191_p0  ;;  %p3198_p1 = por %p3197_p9, %p3196_p7 }
  0x64   : > { %p3199_p4 = pnand %p3198_p1, %p3192_p3 }
  0x66   : > { %3202 = shalt.err (!%p3199_p4)
}
  0x67   : > { %2940 = dma.hbm_to_vmem [thread:$0]  (!%p3791_p13), %s3787_s9, 16, %s3789_s3, %s3804_s18  }
  0x68   : > { %s3203_s30 = scalar_lea.hbm %s3799_s6, 16  ;;  %s3208_s10 = scalar_lea.hbm %s4392_s11, 32 }
  0x69   : > { %p3204_p6 = scmp.ne.s32.totalorder %s3799_s6, %s3203_s30  ;;  %p3209_p7 = scmp.lt.u32.totalorder %s3799_s6, %s4392_s11 }
  0x6a   : > { %p3210_p9 = scmp.lt.u32.totalorder %s3208_s10, %s3203_s30  ;;  %p3212_p11 = scmp.lt.u32.totalorder %s3203_s30, %s3799_s6 }
  0x6b   : > { %p3206_p5 = pnand %p3204_p6, %p3810_p2 }
  0x6c   : > { %p3211_p10 = por %p3210_p9, %p3209_p7 }
  0x6d   : > { %p3207_p8 = pneg %p3206_p5 }
  0x6e   : > { %p3213_p12 = por %p3212_p11, %p3211_p10 }
  0x70   : > { %p3214_p0 = pnand %p3213_p12, %p3207_p8 }
  0x72   : > { %3217 = shalt.err (!%p3214_p0)
}
  0x73   : > { %s3218_s3 = scalar_lea.vmem %s3802_s1, 16  ;;  %s3551_s9 = smov [#allocation11]  }
  0x74   : > { %p3219_p3 = scmp.ne.s32.totalorder %s3802_s1, %s3218_s3  ;;  %s3223_s28 = sshll.u32 %s3551_s9, 4  ;;  %s3224_s28 = int_to_ptr.vmem [resolvable:$false] %s3223_s28 }
  0x75   : > { %s3225_s2 = scalar_lea.vmem %s3224_s28, 32  ;;  %p3226_p6 = scmp.lt.s32.totalorder %s3802_s1, %s3224_s28 }
  0x76   : > { %p3221_p1 = pnand %p3219_p3, %p3810_p2  ;;  %p3227_p5 = scmp.lt.s32.totalorder %s3225_s2, %s3218_s3 }
  0x78   : > { %p3222_p4 = pneg %p3221_p1  ;;  %p3228_p7 = por %p3227_p5, %p3226_p6 }
  0x7a   : > { %p3229_p9 = pnand %p3228_p7, %p3222_p4 }
  0x7c   : > { %3232 = shalt.err (!%p3229_p9)
}
  0x7d   : > { %2943 = dma.hbm_to_vmem [thread:$0]  (!%p3791_p13), %s3799_s6, 16, %s3802_s1, %s3804_s18  }
  0x7e   : > { %s4348_s30 = sshll.u32 %s3777_s16, 3  ;;  %s4347_s29 = sshll.u32 %s3537_s19, 7 }
  0x7f   : > { %s4394_s12 = sld [smem:[#allocation44_spill]]  ;;  %s641_s3 = scalar_lea.vmem [#allocation12], %s4348_s30 }
  0x80   : > { %s648_s9 = sshll.u32 %s641_s3, 4  ;;  %s3873_s6 = scalar_lea.hbm %s4315_s13, %s3780_s5  ;;  %s3867_s9 = int_to_ptr.vmem [resolvable:$true] %s648_s9 }
  0x85   : > { %s3863_s25 = scalar_lea.hbm %s4394_s12, %s4347_s29  ;;  %s3238_s29 = scalar_lea.hbm %s4394_s12, 256 }
  0x86   : > { %s3233_s1 = scalar_lea.hbm %s3863_s25, 128  ;;  %p3239_p12 = scmp.lt.u32.totalorder %s3863_s25, %s4394_s12 }
  0x87   : > { %p3234_p8 = scmp.ne.s32.totalorder %s3863_s25, %s3233_s1  ;;  %p3240_p0 = scmp.lt.u32.totalorder %s3238_s29, %s3233_s1 }
  0x88   : > { %p3242_p1 = scmp.lt.u32.totalorder %s3233_s1, %s3863_s25 }
  0x89   : > { %p3236_p10 = pnand %p3234_p8, %p3810_p2  ;;  %p3241_p3 = por %p3240_p0, %p3239_p12 }
  0x8b   : > { %p3237_p11 = pneg %p3236_p10  ;;  %p3243_p4 = por %p3242_p1, %p3241_p3 }
  0x8d   : > { %p3244_p6 = pnand %p3243_p4, %p3237_p11 }
  0x8f   : > { %3247 = shalt.err (!%p3244_p6)
}
  0x90   : > { %s3248_s3 = scalar_lea.vmem %s3867_s9, 128  ;;  %s3552_s28 = smov [#allocation12]  }
  0x91   : > { %p3249_p5 = scmp.ne.s32.totalorder %s3867_s9, %s3248_s3  ;;  %s3253_s2 = sshll.u32 %s3552_s28, 4  ;;  %s3254_s2 = int_to_ptr.vmem [resolvable:$false] %s3253_s2 }
  0x92   : > { %s3255_s8 = scalar_lea.vmem %s3254_s2, 256  ;;  %p3256_p8 = scmp.lt.s32.totalorder %s3867_s9, %s3254_s2 }
  0x93   : > { %p3251_p7 = pnand %p3249_p5, %p3810_p2  ;;  %p3257_p10 = scmp.lt.s32.totalorder %s3255_s8, %s3248_s3 }
  0x95   : > { %p3252_p9 = pneg %p3251_p7  ;;  %p3258_p12 = por %p3257_p10, %p3256_p8 }
  0x97   : > { %p3259_p0 = pnand %p3258_p12, %p3252_p9 }
  0x99   : > { %3262 = shalt.err (!%p3259_p0)
}
  0x9a   : > { %s4395_s11 = smov 4   ;;  %s4396_s29 = smov 64  }
  0x9b   : > { %2946 = dma.hbm_to_vmem [thread:$0]  (!%p3791_p13), %s3863_s25, 128, %s3867_s9, %s3804_s18, %s4396_s29, %s4396_s29, %s4395_s11  }
  0x9c   : > { %s661_s1 = scalar_lea.vmem [#allocation13], %s3777_s16  ;;  %s4397_s27 = sshll.u32 %s3537_s19, 7 }
  0x9d   : > { %s668_s10 = sshll.u32 %s661_s1, 4  ;;  %s3906_s2 = scalar_lea.hbm %s4316_s14, %s4397_s27  ;;  %s669_s10 = int_to_ptr.vmem [resolvable:$true] %s668_s10 }
  0x9e   : > { %s3263_s8 = scalar_lea.hbm %s3873_s6, 16  ;;  %s3268_s20 = scalar_lea.hbm %s4315_s13, 32 }
  0x9f   : > { %p3264_p11 = scmp.ne.s32.totalorder %s3873_s6, %s3263_s8  ;;  %p3269_p4 = scmp.lt.u32.totalorder %s3873_s6, %s4315_s13 }
  0xa0   : > { %p3270_p6 = scmp.lt.u32.totalorder %s3268_s20, %s3263_s8  ;;  %p3272_p7 = scmp.lt.u32.totalorder %s3263_s8, %s3873_s6 }
  0xa1   : > { %p3266_p3 = pnand %p3264_p11, %p3810_p2 }
  0xa2   : > { %p3271_p5 = por %p3270_p6, %p3269_p4 }
  0xa3   : > { %p3267_p1 = pneg %p3266_p3 }
  0xa4   : > { %p3273_p9 = por %p3272_p7, %p3271_p5 }
  0xa6   : > { %p3274_p8 = pnand %p3273_p9, %p3267_p1 }
  0xa8   : > { %3277 = shalt.err (!%p3274_p8)
}
  0xa9   : > { %s3278_s9 = scalar_lea.vmem %s669_s10, 16  ;;  %s3553_s1 = smov [#allocation13]  }
  0xaa   : > { %p3279_p10 = scmp.ne.s32.totalorder %s669_s10, %s3278_s9  ;;  %s3283_s27 = sshll.u32 %s3553_s1, 4  ;;  %s3284_s27 = int_to_ptr.vmem [resolvable:$false] %s3283_s27 }
  0xab   : > { %s3285_s12 = scalar_lea.vmem %s3284_s27, 32  ;;  %p3286_p11 = scmp.lt.s32.totalorder %s669_s10, %s3284_s27 }
  0xac   : > { %p3281_p12 = pnand %p3279_p10, %p3810_p2  ;;  %p3287_p3 = scmp.lt.s32.totalorder %s3285_s12, %s3278_s9 }
  0xae   : > { %p3282_p0 = pneg %p3281_p12  ;;  %p3288_p13 = por %p3287_p3, %p3286_p11 }
  0xb0   : > { %p3289_p4 = pnand %p3288_p13, %p3282_p0 }
  0xb2   : > { %3292 = shalt.err (!%p3289_p4)
}
  0xb3   : > { %p4398_p6 = scmp.ne.s32.totalorder %s4391_s21, 0  ;;  %s4399_s20 = sshll.u32 %s3777_s16, 3 }
  0xb4   : > { %s679_s22 = scalar_lea.vmem [#allocation14], %s4399_s20  ;;  %s3554_s3 = smov [#allocation5]  }
  0xb5   : > { %2949 = dma.hbm_to_vmem [thread:$0]  (!%p4398_p6), %s3873_s6, 16, %s669_s10, %s3804_s18  }
  0xb6   : > { %s686_s30 = sshll.u32 %s679_s22, 4  ;;  %s3930_s28 = sshll.u32 %s3554_s3, 4  ;;  %s3928_s30 = int_to_ptr.vmem [resolvable:$true] %s686_s30  ;;  %s533_s28 = int_to_ptr.vmem [resolvable:$true] %s3930_s28 }
  0xb7   : > { %s3293_s8 = scalar_lea.hbm %s3906_s2, 128  ;;  %s3298_s1 = scalar_lea.hbm %s4316_s14, 256 }
  0xb8   : > { %p3294_p13 = scmp.ne.s32.totalorder %s3906_s2, %s3293_s8  ;;  %p3299_p7 = scmp.lt.u32.totalorder %s3906_s2, %s4316_s14 }
  0xb9   : > { %p3300_p9 = scmp.lt.u32.totalorder %s3298_s1, %s3293_s8  ;;  %p3302_p10 = scmp.lt.u32.totalorder %s3293_s8, %s3906_s2 }
  0xba   : > { %p3296_p1 = pnand %p3294_p13, %p3810_p2 }
  0xbb   : > { %p3301_p8 = por %p3300_p9, %p3299_p7 }
  0xbc   : > { %p3297_p5 = pneg %p3296_p1 }
  0xbd   : > { %p3303_p12 = por %p3302_p10, %p3301_p8 }
  0xbf   : > { %p3304_p0 = pnand %p3303_p12, %p3297_p5 }
  0xc1   : > { %3307 = shalt.err (!%p3304_p0)
}
  0xc2   : > { %s3308_s6 = scalar_lea.vmem %s3928_s30, 128  ;;  %s3555_s10 = smov [#allocation14]  }
  0xc3   : > { %p3309_p11 = scmp.ne.s32.totalorder %s3928_s30, %s3308_s6  ;;  %s3313_s20 = sshll.u32 %s3555_s10, 4  ;;  %s3314_s20 = int_to_ptr.vmem [resolvable:$false] %s3313_s20 }
  0xc4   : > { %s3315_s22 = scalar_lea.vmem %s3314_s20, 256  ;;  %p3316_p13 = scmp.lt.s32.totalorder %s3928_s30, %s3314_s20 }
  0xc5   : > { %p3311_p3 = pnand %p3309_p11, %p3810_p2  ;;  %p3317_p1 = scmp.lt.s32.totalorder %s3315_s22, %s3308_s6 }
  0xc7   : > { %p3312_p4 = pneg %p3311_p3  ;;  %p3318_p7 = por %p3317_p1, %p3316_p13 }
  0xc9   : > { %p3319_p9 = pnand %p3318_p7, %p3312_p4 }
  0xcb   : > { %3322 = shalt.err (!%p3319_p9)
}
  0xcc   : > { %2952 = dma.hbm_to_vmem [thread:$0]  (!%p4398_p6), %s3906_s2, 128, %s3928_s30, %s3804_s18, %s4396_s29, %s4396_s29, %s4395_s11  }
  0xcd   : > { %s4400_s25 = sld [smem:[#allocation34_spill]]  ;;  %p4401_p8 = scmp.ne.s32.totalorder %s4386_s24, 0 }
  0xd3   : > { %s3323_s9 = scalar_lea.hbm %s4400_s25, 128 }
  0xd4   : > { %p3324_p5 = scmp.ne.s32.totalorder %s4400_s25, %s3323_s9  ;;  %p3330_p0 = scmp.lt.u32.totalorder %s3323_s9, %s4400_s25 }
  0xd6   : > { %p3326_p10 = pnand %p3324_p5, %p4401_p8 }
  0xd8   : > { %p3327_p12 = pneg %p3326_p10 }
  0xda   : > { %p3332_p11 = pnand %p3330_p0, %p3327_p12 }
  0xdc   : > { %3335 = shalt.err (!%p3332_p11)
}
  0xdd   : > { %s3336_s10 = scalar_lea.vmem %s533_s28, 128  ;;  %p3344_p1 = scmp.lt.s32.totalorder %s533_s28, %s533_s28 }
  0xde   : > { %p3337_p3 = scmp.ne.s32.totalorder %s533_s28, %s3336_s10  ;;  %p3345_p7 = scmp.lt.s32.totalorder %s3336_s10, %s3336_s10 }
  0xe0   : > { %p3339_p4 = pnand %p3337_p3, %p4401_p8  ;;  %p3346_p9 = por %p3345_p7, %p3344_p1 }
  0xe2   : > { %p3340_p13 = pneg %p3339_p4 }
  0xe4   : > { %p3347_p6 = pnand %p3346_p9, %p3340_p13 }
  0xe6   : > { %3350 = shalt.err (!%p3347_p6)
}
  0xe7   : > { %p4402_p5 = scmp.ne.s32.totalorder %s4384_s26, 0  ;;  %s3983_s3 = scalar_lea.hbm %s4317_s15, %s3780_s5 }
  0xe8   : > { %s699_s8 = scalar_lea.vmem [#allocation15], %s3777_s16  ;;  %s3351_s1 = scalar_lea.hbm %s3983_s3, 16 }
  0xe9   : > { %2930 = dma.hbm_to_vmem [thread:$0]  (!%p4402_p5), %s4400_s25, 128, %s533_s28, [#allocation6], %s4396_s29, %s4396_s29, %s4395_s11  }
  0xea   : > { %s706_s9 = sshll.u32 %s699_s8, 4  ;;  %p3352_p6 = scmp.ne.s32.totalorder %s3983_s3, %s3351_s1  ;;  %s707_s9 = int_to_ptr.vmem [resolvable:$true] %s706_s9 }
  0xeb   : > { %s3356_s28 = scalar_lea.hbm %s4317_s15, 32  ;;  %p3357_p0 = scmp.lt.u32.totalorder %s3983_s3, %s4317_s15 }
  0xec   : > { %p3354_p10 = pnand %p3352_p6, %p3810_p2  ;;  %p3358_p11 = scmp.lt.u32.totalorder %s3356_s28, %s3351_s1 }
  0xed   : > { %p3360_p4 = scmp.lt.u32.totalorder %s3351_s1, %s3983_s3 }
  0xee   : > { %p3355_p12 = pneg %p3354_p10  ;;  %p3359_p3 = por %p3358_p11, %p3357_p0 }
  0xf0   : > { %p3361_p13 = por %p3360_p4, %p3359_p3 }
  0xf2   : > { %p3362_p1 = pnand %p3361_p13, %p3355_p12 }
  0xf4   : > { %3365 = shalt.err (!%p3362_p1)
}
  0xf5   : > { %s3366_s2 = scalar_lea.vmem %s707_s9, 16  ;;  %s3556_s30 = smov [#allocation15]  }
  0xf6   : > { %p3367_p7 = scmp.ne.s32.totalorder %s707_s9, %s3366_s2  ;;  %s3371_s20 = sshll.u32 %s3556_s30, 4  ;;  %s3372_s20 = int_to_ptr.vmem [resolvable:$false] %s3371_s20 }
  0xf7   : > { %s3373_s22 = scalar_lea.vmem %s3372_s20, 32  ;;  %p3374_p10 = scmp.lt.s32.totalorder %s707_s9, %s3372_s20 }
  0xf8   : > { %p3369_p9 = pnand %p3367_p7, %p3810_p2  ;;  %p3375_p5 = scmp.lt.s32.totalorder %s3373_s22, %s3366_s2 }
  0xfa   : > { %p3370_p6 = pneg %p3369_p9  ;;  %p3376_p8 = por %p3375_p5, %p3374_p10 }
  0xfc   : > { %p3377_p0 = pnand %p3376_p8, %p3370_p6 }
  0xfe   : > { %3380 = shalt.err (!%p3377_p0)
}
  0xff   : > { %p4403_p11 = scmp.ne.s32.totalorder %s4391_s21, 0  ;;  %s3557_s8 = smov [#allocation7]  }
 0x100   : > { %s549_s1 = sshll.u32 %s3557_s8, 4  ;;  %s3558_s27 = smov [#allocation8]   ;;  %s550_s1 = int_to_ptr.vmem [resolvable:$true] %s549_s1 }
 0x101   : > { %2955 = dma.hbm_to_vmem [thread:$0]  (!%p4403_p11), %s3983_s3, 16, %s707_s9, %s3804_s18  }
 0x102   : > { %s565_s12 = sshll.u32 %s3558_s27, 4  ;;  %s4404_s4 = sld [smem:[#allocation36_spill]]  ;;  %s566_s12 = int_to_ptr.vmem [resolvable:$true] %s565_s12 }
 0x103   : > { %p4405_p5 = scmp.ne.s32.totalorder %s4386_s24, 0 }
 0x108   : > { %s3381_s10 = scalar_lea.hbm %s4404_s4, 16 }
 0x109   : > { %p3382_p8 = scmp.ne.s32.totalorder %s4404_s4, %s3381_s10  ;;  %p3388_p4 = scmp.lt.u32.totalorder %s3381_s10, %s4404_s4 }
 0x10b   : > { %p3384_p12 = pnand %p3382_p8, %p4405_p5 }
 0x10d   : > { %p3385_p3 = pneg %p3384_p12 }
 0x10f   : > { %p3390_p13 = pnand %p3388_p4, %p3385_p3 }
 0x111   : > { %3393 = shalt.err (!%p3390_p13)
}
 0x112   : > { %s3394_s3 = scalar_lea.vmem %s550_s1, 16  ;;  %s3401_s9 = scalar_lea.vmem %s550_s1, 32 }
 0x113   : > { %p3395_p1 = scmp.ne.s32.totalorder %s550_s1, %s3394_s3  ;;  %p3402_p6 = scmp.lt.s32.totalorder %s550_s1, %s550_s1 }
 0x114   : > { %p3403_p10 = scmp.lt.s32.totalorder %s3401_s9, %s3394_s3 }
 0x115   : > { %p3397_p7 = pnand %p3395_p1, %p4405_p5 }
 0x116   : > { %p3404_p0 = por %p3403_p10, %p3402_p6 }
 0x117   : > { %p3398_p9 = pneg %p3397_p7 }
 0x119   : > { %p3405_p11 = pnand %p3404_p0, %p3398_p9 }
 0x11b   : > { %3408 = shalt.err (!%p3405_p11)
}
 0x11c   : > { %p4406_p8 = scmp.ne.s32.totalorder %s4384_s26, 0  ;;  %s4407_s7 = sld [smem:[#allocation39_spill]] }
 0x11e   : > { %2933 = dma.hbm_to_vmem [thread:$0]  (!%p4406_p8), %s4404_s4, 16, %s550_s1, [#allocation6]  }
 0x122   : > { %s3409_s10 = scalar_lea.hbm %s4407_s7, 128 }
 0x123   : > { %p3410_p12 = scmp.ne.s32.totalorder %s4407_s7, %s3409_s10  ;;  %p3416_p11 = scmp.lt.u32.totalorder %s3409_s10, %s4407_s7 }
 0x125   : > { %p3412_p3 = pnand %p3410_p12, %p4405_p5 }
 0x127   : > { %p3413_p4 = pneg %p3412_p3 }
 0x129   : > { %p3418_p13 = pnand %p3416_p11, %p3413_p4 }
 0x12b   : > { %3421 = shalt.err (!%p3418_p13)
}
 0x12c   : > { %s3422_s3 = scalar_lea.vmem %s566_s12, 128  ;;  %p3430_p6 = scmp.lt.s32.totalorder %s566_s12, %s566_s12 }
 0x12d   : > { %p3423_p1 = scmp.ne.s32.totalorder %s566_s12, %s3422_s3  ;;  %p3431_p10 = scmp.lt.s32.totalorder %s3422_s3, %s3422_s3 }
 0x12f   : > { %p3425_p7 = pnand %p3423_p1, %p4405_p5  ;;  %p3432_p0 = por %p3431_p10, %p3430_p6 }
 0x131   : > { %p3426_p9 = pneg %p3425_p7 }
 0x133   : > { %p3433_p2 = pnand %p3432_p0, %p3426_p9 }
 0x135   : > { %3436 = shalt.err (!%p3433_p2)
}
 0x136   : > { %2936 = dma.hbm_to_vmem [thread:$0]  (!%p4406_p8), %s4407_s7, 128, %s566_s12, [#allocation9], %s4396_s29, %s4396_s29, %s4395_s11  }
 0x137   : > { %s4047_s27 = scalar_lea.hbm %s4319_s17, %s3780_s5  ;;  %s724_s26 = scalar_lea.vmem [#allocation16], %s3777_s16 }
 0x138   : > { %s731_s28 = sshll.u32 %s724_s26, 4  ;;  %s3437_s6 = scalar_lea.hbm %s4047_s27, 16  ;;  %s732_s28 = int_to_ptr.vmem [resolvable:$true] %s731_s28 }
 0x139   : > { %p3438_p2 = scmp.ne.s32.totalorder %s4047_s27, %s3437_s6  ;;  %p4408_p5 = scmp.ne.s32.totalorder %s4393_s0, 0 }
 0x13a   : > { %s3442_s11 = scalar_lea.hbm %s4319_s17, 32  ;;  %p3443_p8 = scmp.lt.u32.totalorder %s4047_s27, %s4319_s17 }
 0x13b   : > { %p3440_p12 = pnand %p3438_p2, %p4408_p5  ;;  %p3444_p4 = scmp.lt.u32.totalorder %s3442_s11, %s3437_s6 }
 0x13c   : > { %p3446_p13 = scmp.lt.u32.totalorder %s3437_s6, %s4047_s27 }
 0x13d   : > { %p3441_p3 = pneg %p3440_p12  ;;  %p3445_p11 = por %p3444_p4, %p3443_p8 }
 0x13f   : > { %p3447_p1 = por %p3446_p13, %p3445_p11 }
 0x141   : > { %p3448_p7 = pnand %p3447_p1, %p3441_p3 }
 0x143   : > { %3451 = shalt.err (!%p3448_p7)
}
 0x144   : > { %s3452_s5 = scalar_lea.vmem %s732_s28, 16  ;;  %s3559_s16 = smov [#allocation16]  }
 0x145   : > { %p3453_p9 = scmp.ne.s32.totalorder %s732_s28, %s3452_s5  ;;  %s3457_s2 = sshll.u32 %s3559_s16, 4  ;;  %s3458_s2 = int_to_ptr.vmem [resolvable:$false] %s3457_s2 }
 0x146   : > { %s3459_s20 = scalar_lea.vmem %s3458_s2, 32  ;;  %p3460_p0 = scmp.lt.s32.totalorder %s732_s28, %s3458_s2 }
 0x147   : > { %p3455_p6 = pnand %p3453_p9, %p4408_p5  ;;  %p3461_p2 = scmp.lt.s32.totalorder %s3459_s20, %s3452_s5 }
 0x149   : > { %p3456_p10 = pneg %p3455_p6  ;;  %p3462_p12 = por %p3461_p2, %p3460_p0 }
 0x14b   : > { %p3463_p4 = pnand %p3462_p12, %p3456_p10 }
 0x14d   : > { %3466 = shalt.err (!%p3463_p4)
}
 0x14e   : > { %p4409_p8 = scmp.ne.s32.totalorder %s4391_s21, 0  ;;  %p4410_p3 = scmp.ne.s32.totalorder %s4383_s23, 0 }
 0x14f   : > { %s4411_s0 = sld [smem:[#allocation27_spill]] (!%p4410_p3) }
 0x150   : > { %2958 = dma.hbm_to_vmem [thread:$0]  (!%p4409_p8), %s4047_s27, 16, %s732_s28, %s3804_s18  }
 0x151   : > { %740 = sbr.rel (%p4410_p3) target bundleno = 5001 (0x1389), region = 92 }
 0x155   : > { %p4412_p5 = scmp.ne.s32.totalorder (!%p4410_p3), %s4411_s0, 0 }
 0x158   : > { %3500 = dma.done.wait (%p4412_p5), [#allocation4], 128  }
 0x159   : > { %3502 = vsyncadd (%p4412_p5), [#allocation4], 4294967168 }
 0x15a   : > { %3504 = dma.done.wait (%p4412_p5), [#allocation6], 144  }
 0x15b   : > { %3506 = vsyncadd (%p4412_p5), [#allocation6], 4294967152 }
 0x15c   : > { %3508 = dma.done.wait (%p4412_p5), [#allocation9], 128  }
 0x15d   : > { %3510 = vsyncadd (%p4412_p5), [#allocation9], 4294967168  ;;  %s4413_s23 = sld [smem:[#allocation26_spill]]  ;;  %s4415_s18 = sld [smem:[#allocation21_spill]] }
 0x15e   : > { %s4416_s22 = sld [smem:[#allocation28_spill]] }
 0x163   : > { %s4414_s21 = sadd.s32 4294967295, %s4413_s23   ;;  %s4085_s1 = sand.u32 1, %s4415_s18  }
 0x164   : > { %s758_s3 = sand.u32 1, %s4414_s21   ;;  %p4417_p11 = scmp.ne.s32.totalorder %s4416_s22, 0 }
 0x165   : > { %s759_s9 = scalar_lea.sflag [#allocation4], %s758_s3 }
 0x166   : > { %3512 = dma.done.wait (%p4417_p11), %s759_s9, 336  }
 0x167   : > { %3514 = vsyncadd (%p4417_p11), %s759_s9, 4294966960  ;;  %s4418_s8 = sld [smem:[#allocation24_spill]]  ;;  %s4419_s27 = sld [smem:[#allocation23_spill]] }
 0x168   : > { %s2714_s26 = sshll.u32 %s4085_s1, 3  ;;  %s4420_s29 = sld [smem:[#allocation32_spill]] }
 0x169   : > { %s4421_s20 = sld [smem:[#allocation41_spill]]  ;;  %s4422_s18 = sld [smem:[#allocation42_spill]] }
 0x16a   : > { %s4423_s4 = sld [smem:[#allocation46_spill]]  ;;  %s4121_s16 = scalar_lea.vmem [#allocation12], %s2714_s26 }
 0x16b   : > { %s786_s2 = scalar_lea.vmem [#allocation13], %s4085_s1  ;;  %s803_s23 = scalar_lea.vmem [#allocation15], %s4085_s1 }
 0x16d   : > { %p909_p13 = scmp.lt.s32.totalorder %s4418_s8, 1  ;;  %p914_p1 = scmp.lt.s32.totalorder %s4419_s27, 1 }
 0x16e   : > { %p2726_p7 = scmp.ne.s32.totalorder %s4419_s27, 0 }
 0x16f   : > { %s4446_s8 = smov (!%p909_p13, %s4418_s8), 1  ;;  %v3048_v1 = vld [vmem:[#allocation3] sm:$0xff] (!%p2726_p7)   ;;  %v3560_v3 = vmov (!%p2726_p7), 0.0   ;;  %vm3561_vm0 = vmmov (!%p2726_p7), 0   ;;  %vm982_vm1 = vcmask (!%p2726_p7), 130048  }
 0x170   : > { %s915_s28 = scalar_select %p914_p1, %s4419_s27, 1 }
 0x171   : > { %s2768_s6 = sshll.u32 %s4446_s8, 4  ;;  %s2772_s10 = sshll.u32 %s4446_s8, 5  ;;  %2804 = vmatprep.subr.bf16.mxu0 (!%p2726_p7), %v3560_v3  ;;  %2806 = vmatprep.mubr.msk.bf16.mxu0 (!%p2726_p7), %vm3561_vm0, %v3560_v3 }
 0x172   : > { %s913_s12 = scalar_lea.vmem %s4420_s29, %s2768_s6  ;;  %s2769_s5 = sshll.u32 %s915_s28, 3  ;;  %2805 = vmatpush3.bf16.msra.mxu0 (!%p2726_p7), %v3048_v1 }
 0x173   : > { %s4103_s0 = scalar_lea.vmem %s4421_s20, %s2769_s5  ;;  %s4108_s22 = scalar_lea.vmem %s4422_s18, %s2769_s5  ;;  %v939_v0 = vld [vmem:[%s913_s12] sm:$0xff] (!%p2726_p7)  ;;  %v940_v2 = vld [vmem:[%s913_s12 + $0x8] sm:$0xff] (!%p2726_p7) }
 0x174   : > { %s2771_s3 = sshll.u32 %s915_s28, 5  ;;  %s4113_s8 = scalar_lea.vmem %s4423_s4, %s2772_s10  ;;  %941 = vxpose.xlu0.b32.start [1/2] (short) (narrow) (!%p2726_p7), %v939_v0, 16 }
 0x175   : > { %s4424_s6 = sld [smem:[#allocation45_spill]]  ;;  %s769_s29 = scalar_lea.vmem [#allocation11], %s4085_s1 }
 0x176   : > { %s4124_s20 = scalar_lea.vmem [#allocation14], %s2714_s26  ;;  %s811_s5 = scalar_lea.vmem [#allocation16], %s4085_s1 }
 0x177   : > { %938 = sbr.rel (%p2726_p7) target bundleno = 722 (0x2d2), region = 140 }
 0x178   : > { %942 = vxpose.xlu0.b32.end [2/2] (short) (narrow) (!%p2726_p7), %v940_v2, 16 }
 0x17b   : > { %s4118_s11 = scalar_lea.vmem %s4424_s6, %s2771_s3 }
 0x1f4   : > { %v957_v4 = vpop.trf.xlu0 }
 0x1f8   : > { %v958_v5 = vpop.trf.xlu0 }
 0x1f9   : > { %v973_v6 = vpack.c.bf16 %v958_v5, %v957_v4 }
 0x1fb   : > { %2807 = vmatmul.mubr.msk.bf16.vlgmr.msra.gmra.mrb[0].mxu0 %vm982_vm1, %v973_v6 }
 0x2ce   : > { %v1020_v7 = vpop.f32.mrb[0].mxu0 }
 0x2cf   : > { %1027 = vst.msk [vmem:[#allocation2] sm:$0xff] %vm982_vm1, %v1020_v7  ;;  %v2808_v8 = vpop.f32.mrb[1].mxu0 }
 0x2d0   : > { %v1023_v9 = vpop.f32.mrb[2].mxu0 }
 0x2d1   : > { %1028 = vst.msk [vmem:[#allocation2 + $0x8] sm:$0xff] %vm982_vm1, %v1023_v9  ;;  %v2809_v10 = vpop.f32.mrb[3].mxu0 }
 0x2d2 PF: > { %vm1032_vm2 = vcmask 130048   ;;  %v3094_v25 = vld [vmem:[%s4103_s0] sm:$0xff]   ;;  %v3562_v26 = vmov 0.0   ;;  %vm3563_vm3 = vmmov 0   ;;  %s4425_s24 = sld [smem:[#allocation37_spill]]  ;;  %s3564_s27 = smov 16  }
 0x2d3   : > { %2810 = vmatprep.subr.bf16.mxu1 %v3562_v26  ;;  %2812 = vmatprep.mubr.msk.bf16.mxu1 %vm3563_vm3, %v3562_v26  ;;  %s4426_s10 = scalar_lea.vmem [#allocation10], %s4085_s1  ;;  %v3095_v43 = vld [vmem:[#allocation8] sm:$0xff]   ;;  %s3565_s12 = smov 112   ;;  %vm1565_vm4 = vcmask 64512   ;;  %vm2156_vm7 = vcmask 523264  }
 0x2d4   : > { %2811 = vmatpush3.bf16.msra.mxu1 %v3094_v25  ;;  %2822 = vmatprep.subr.bf16.mxu0 %v3562_v26  ;;  %v2729_v38 = vld [vmem:[%s4426_s10] ss:$0 sm:$0xff]  ;;  %s4427_s18 = sld [smem:[#allocation38_spill]]  ;;  %s3566_s30 = smov 96  }
 0x2d5   : > { %2816 = vmatprep.subr.bf16.mxu1 %v3562_v26  ;;  %2824 = vmatprep.mubr.msk.bf16.mxu0 %vm3563_vm3, %v3562_v26 }
 0x2d6   : > { %v4129_v11 = vld [vmem:[#allocation2] sm:$0xff]  ;;  %2823 = vmatpush3.bf16.msra.mxu0 %v3095_v43 }
 0x2d7   : > { %v1033_v13 = vsel %vm1032_vm2, %v4129_v11, 0.0  ;;  %2834 = vmatprep.subr.bf16.mxu0 %v3562_v26 }
 0x2d8   : > { %v4131_v12 = vld [vmem:[#allocation2 + $0x8] sm:$0xff]  ;;  %1034 = vadd.xlane.f32.xlu0 %v1033_v13  ;;  %v1121_v27 = vld [vmem:[%s4425_s24] sm:$0xff] }
 0x2d9   : > { %v1036_v14 = vsel %vm1032_vm2, %v4131_v12, 0.0  ;;  %v1122_v28 = vld [vmem:[%s4425_s24 + $0x8] sm:$0xff] }
 0x2da   : > { %v1123_v50 = vld [vmem:[%s4427_s18] sm:$0xff]  ;;  %v1124_v52 = vld [vmem:[%s4427_s18 + $0x8] sm:$0xff] }
 0x2dc   : > { %1037 = vadd.xlane.f32.xlu0 %v1036_v14 }
 0x365   : > { %v1035_v15 = vpop.xlane.xlu0 %1034 }
 0x366   : > { %v1040_v16 = vmul.f32 0.0625, %v1035_v15 }
 0x368   : > { %v1042_v17 = vsub.f32 %v4129_v11, %v1040_v16 }
 0x369   : > { %v1038_v18 = vpop.xlane.xlu0 %1037 }
 0x36a   : > { %v1041_v19 = vmul.f32 0.0625, %v1038_v18  ;;  %v1044_v20 = vmul.f32 %v1042_v17, %v1042_v17 }
 0x36c   : > { %v1043_v21 = vsub.f32 %v4131_v12, %v1041_v19  ;;  %v1046_v22 = vsel %vm1032_vm2, %v1044_v20, 0.0 }
 0x36d   : > { %1047 = vadd.xlane.f32.xlu1 %v1046_v22 }
 0x36e   : > { %v1045_v23 = vmul.f32 %v1043_v21, %v1043_v21 }
 0x370   : > { %v1049_v24 = vsel %vm1032_vm2, %v1045_v23, 0.0 }
 0x371   : > { %1050 = vadd.xlane.f32.xlu1 %v1049_v24 }
 0x382   : > { %1186 = vrot.lane.b32.xlu1 %v1121_v27, %s3564_s27 }
 0x386   : > { %1188 = vrot.lane.b32.xlu1 %v1122_v28, %s3564_s27 }
 0x3fa   : > { %v1048_v29 = vpop.xlane.xlu1 %1047 }
 0x3fb   : > { %v1052_v30 = vmul.f32 0.0625, %v1048_v29 }
 0x3fd   : > { %v1054_v31 = vadd.f32 1e-05, %v1052_v30 }
 0x3fe   : > { %v1051_v32 = vpop.xlane.xlu1 %1050 }
 0x3ff   : > { %3103 = vrsqrt.f32 %v1054_v31  ;;  %v1053_v33 = vmul.f32 0.0625, %v1051_v32 }
 0x401   : > { %v1055_v34 = vadd.f32 1e-05, %v1053_v33 }
 0x402   : > { %v1187_v4 = vpop.permute.xlu1 %1186 }
 0x403   : > { %3105 = vrsqrt.f32 %v1055_v34 }
 0x406   : > { %v1189_v5 = vpop.permute.xlu1 %1188 }
 0x409   : > { %v3104_v35 = vpop.eup %3103 }
 0x40a   : > { %v1058_v36 = vmul.f32 %v3104_v35, %v1042_v17 }
 0x40c   : > { %v1066_v40 = vmul.f32 %v2729_v38, %v1058_v36 }
 0x40d   : > { %v3106_v37 = vpop.eup %3105 }
 0x40e   : > { %v1059_v39 = vmul.f32 %v3106_v37, %v1043_v21 }
 0x410   : > { %v1067_v41 = vmul.f32 %v2729_v38, %v1059_v39 }
 0x412   : > { %v1068_v42 = vpack.c.bf16 %v1067_v41, %v1066_v40 }
 0x414   : > { %2813 = vmatmul.mubr.msk.bf16.vlgmr.msra.gmra.mrb[0].mxu1 %vm1032_vm2, %v1068_v42 }
 0x415   : > { %2818 = vmatprep.mubr.msk.bf16.mxu1 %vm3563_vm3, %v3562_v26  ;;  %2817 = vmatpush3.bf16.msra.mxu1 %v3095_v43  ;;  %v1660_v43 = vlaneseq }
 0x416   : > { %2828 = vmatprep.subr.bf16.mxu1 %v3562_v26 }
 0x4e7   : > { %v4164_v44 = vpop.f32.mrb[0].mxu1 }
 0x4e8   : > { %v2814_v45 = vpop.f32.mrb[1].mxu1  ;;  %v1127_v55 = vmul.f32 %v1121_v27, %v4164_v44  ;;  %v1192_v6 = vmul.f32 %v1187_v4, %v4164_v44 }
 0x4e9   : > { %v4166_v46 = vpop.f32.mrb[2].mxu1  ;;  %v1663_v45 = vshrl.u32 %v1660_v43, 7 }
 0x4ea   : > { %v2815_v47 = vpop.f32.mrb[3].mxu1  ;;  %v1129_v48 = vpack.c.bf16 %v4166_v46, %v4164_v44  ;;  %v1128_v57 = vmul.f32 %v1122_v28, %v4166_v46  ;;  %v1193_v8 = vmul.f32 %v1189_v5, %v4166_v46 }
 0x4eb   : > { %v1661_v47 = vand.u32 127, %v1660_v43 }
 0x4ec   : > { %1195 = vrot.lane.b32.xlu0 %v1129_v48, %s3565_s12  ;;  %2819 = vmatmul.mubr.msk.bf16.vlgmr.msra.gmra.mrb[4].mxu1 %vm1032_vm2, %v1129_v48  ;;  %v1664_v48 = vadd.s32 8, %v1663_v45 }
 0x4ed   : > { %2830 = vmatprep.mubr.msk.bf16.mxu1 %vm3563_vm3, %v3562_v26  ;;  %vm1665_vm5 = vcmp.le.s32.totalorder %v1661_v47, %v1663_v45 }
 0x4ee   : > { %vm1666_vm6 = vcmp.le.s32.totalorder %v1661_v47, %v1664_v48 }
 0x55e   : > { %v1196_v49 = vpop.permute.xlu0 %1195 }
 0x55f   : > { %2825 = vmatmul.mubr.msk.bf16.vlgmr.msra.gmra.mrb[0].mxu0 %vm1032_vm2, %v1196_v49 }
 0x560   : > { %2836 = vmatprep.mubr.msk.bf16.mxu0 %vm3563_vm3, %v3562_v26 }
 0x5bf   : > { %v1173_v51 = vpop.f32.mrb[4].mxu1 }
 0x5c0   : > { %v1180_v53 = vmul.f32 %v1173_v51, %v1123_v50  ;;  %v2820_v54 = vpop.f32.mrb[5].mxu1 }
 0x5c1   : > { %v1176_v56 = vpop.f32.mrb[6].mxu1 }
 0x5c2   : > { %v1181_v58 = vmul.f32 %v1176_v56, %v1124_v52  ;;  %v2821_v59 = vpop.f32.mrb[7].mxu1  ;;  %v1182_v60 = vadd.f32 %v1180_v53, %v1127_v55 }
 0x5c4   : > { %v1183_v61 = vadd.f32 %v1181_v58, %v1128_v57  ;;  %v1253_v14 = vmul.f32 0.35355338, %v1182_v60 }
 0x5c6   : > { %v1254_v15 = vmul.f32 0.35355338, %v1183_v61 }
 0x632   : > { %v1234_v62 = vpop.f32.mrb[0].mxu0 }
 0x633   : > { %v1241_v63 = vmul.f32 %v1234_v62, %v1123_v50  ;;  %v2826_v0 = vpop.f32.mrb[1].mxu0 }
 0x634   : > { %v1237_v1 = vpop.f32.mrb[2].mxu0 }
 0x635   : > { %v1242_v2 = vmul.f32 %v1237_v1, %v1124_v52  ;;  %1245 = vrot.lane.b32.xlu1 %v1241_v63, %s3564_s27  ;;  %v2827_v3 = vpop.f32.mrb[3].mxu0 }
 0x637   : > { %1247 = vrot.lane.b32.xlu0 %v1242_v2, %s3564_s27 }
 0x6a7   : > { %v1246_v7 = vpop.permute.xlu1 %1245 }
 0x6a8   : > { %v1251_v9 = vadd.f32 %v1246_v7, %v1192_v6 }
 0x6a9   : > { %v1248_v10 = vpop.permute.xlu0 %1247 }
 0x6aa   : > { %v1252_v13 = vadd.f32 %v1248_v10, %v1193_v8  ;;  %1355 = vrot.lane.b32.xlu1 %v1251_v9, %s3565_s12 }
 0x6ac   : > { %1357 = vrot.lane.b32.xlu0 %v1252_v13, %s3565_s12 }
 0x6ca   : > { %1255 = vxpose.xlu0.b32.start [1/2] (short) (narrow) %v1253_v14, 16 }
 0x6ce   : > { %1256 = vxpose.xlu0.b32.end [2/2] (short) (narrow) %v1254_v15, 16 }
 0x71c   : > { %v1356_v16 = vpop.permute.xlu1 %1355 }
 0x71d   : > { %1361 = vxpose.xlu1.b32.start [1/2] (short) (narrow) %v1356_v16, 16 }
 0x71e   : > { %v1358_v17 = vpop.permute.xlu0 %1357 }
 0x721   : > { %1362 = vxpose.xlu1.b32.end [2/2] (short) (narrow) %v1358_v17, 16 }
 0x74a   : > { %v1271_v18 = vpop.trf.xlu0 }
 0x74e   : > { %v1272_v22 = vpop.trf.xlu0 }
 0x74f   : > { %v3061_v23 = vpack.i.bf16 %v1272_v22, %v1271_v18 }
 0x79d   : > { %v1377_v19 = vpop.trf.xlu1 }
 0x7a1   : > { %v1378_v20 = vpop.trf.xlu1 }
 0x7a2   : > { %v3049_v21 = vpack.i.bf16 %v1378_v20, %v1377_v19 }
 0x7a4   : > { %3050 = vxpose.xlu0.b32.start.end [1/1] (short) (narrow) %v3049_v21, 16 }
 0x7a9   : > { %3062 = vxpose.xlu0.b32.start.end [1/1] (short) (narrow) %v3061_v23, 16 }
 0x824   : > { %v3051_v24 = vpop.trf.xlu0 }
 0x825   : > { %v3055_v25 = vunpack.i.h.bf16 %v3051_v24  ;;  %v3052_v27 = vunpack.i.l.bf16 %v3051_v24 }
 0x828   : > { %v3056_v28 = vpop.trf.xlu0 }
 0x829   : > { %v3060_v29 = vunpack.i.h.bf16 %v3056_v28  ;;  %v3057_v30 = vunpack.i.l.bf16 %v3056_v28 }
 0x82b   : > { %v1457_v31 = vpack.c.bf16 %v3057_v30, %v3052_v27  ;;  %v1458_v32 = vpack.c.bf16 %v3060_v29, %v3055_v25 }
 0x82c   : > { %v3063_v33 = vpop.trf.xlu0 }
 0x82d   : > { %v1570_v34 = vsel %vm1565_vm4, %v1457_v31, 0  ;;  %v1617_v35 = vsel %vm1565_vm4, %v1458_v32, 0  ;;  %v3067_v36 = vunpack.i.h.bf16 %v3063_v33  ;;  %v3064_v37 = vunpack.i.l.bf16 %v3063_v33 }
 0x82e   : > { %2829 = vmatpush3.bf16.xpose.msra.mxu1 %v1570_v34  ;;  %2835 = vmatpush3.bf16.xpose.msra.mxu0 %v1617_v35 }
 0x82f   : > { %2840 = vmatprep.subr.bf16.mxu1 %v3562_v26  ;;  %2846 = vmatprep.subr.bf16.mxu0 %v3562_v26 }
 0x830   : > { %v3068_v38 = vpop.trf.xlu0 }
 0x831   : > { %v3072_v39 = vunpack.i.h.bf16 %v3068_v38  ;;  %v3069_v40 = vunpack.i.l.bf16 %v3068_v38 }
 0x833   : > { %v1351_v41 = vpack.c.bf16 %v3069_v40, %v3064_v37  ;;  %v1352_v42 = vpack.c.bf16 %v3072_v39, %v3067_v36 }
 0x835   : > { %2831 = vmatmul.mubr.msk.bf16.vlgmr.msra.gmra.mrb[8].mxu1 %vm1565_vm4, %v1351_v41  ;;  %2837 = vmatmul.mubr.msk.bf16.vlgmr.msra.gmra.mrb[4].mxu0 %vm1565_vm4, %v1352_v42 }
 0x836   : > { %2842 = vmatprep.mubr.msk.bf16.mxu1 %vm3563_vm3, %v3562_v26  ;;  %2848 = vmatprep.mubr.msk.bf16.mxu0 %vm3563_vm3, %v3562_v26 }
 0x908   : > { %v1606_v49 = vpop.f32.mrb[8].mxu1  ;;  %v1653_v50 = vpop.f32.mrb[4].mxu0 }
 0x909   : > { %v1667_v51 = vsel %vm1665_vm5, %v1606_v49, -1e+30  ;;  %v2832_v52 = vpop.f32.mrb[9].mxu1  ;;  %v2838_v53 = vpop.f32.mrb[5].mxu0  ;;  %v1669_v61 = vsel %vm1665_vm5, %v1653_v50, -1e+30 }
 0x90a   : > { %v1609_v54 = vpop.f32.mrb[10].mxu1  ;;  %v1656_v55 = vpop.f32.mrb[6].mxu0  ;;  %v1671_v56 = vsel %vm1032_vm2, %v1667_v51, -inf  ;;  %v1677_v62 = vsel %vm1032_vm2, %v1669_v61, -inf }
 0x90b   : > { %v1668_v57 = vsel %vm1666_vm6, %v1609_v54, -1e+30  ;;  %v2839_v58 = vpop.f32.mrb[7].mxu0  ;;  %1672 = vmax.xlane.f32.xlu0 %v1671_v56  ;;  %v2833_v59 = vpop.f32.mrb[11].mxu1  ;;  %v1670_v63 = vsel %vm1666_vm6, %v1656_v55, -1e+30 }
 0x90c   : > { %v1674_v60 = vsel %vm1032_vm2, %v1668_v57, -inf  ;;  %v1680_v0 = vsel %vm1032_vm2, %v1670_v63, -inf }
 0x90d   : > { %1675 = vmax.xlane.f32.xlu1 %v1674_v60 }
 0x911   : > { %1678 = vmax.xlane.f32.xlu1 %v1677_v62 }
 0x915   : > { %1681 = vmax.xlane.f32.xlu1 %v1680_v0 }
 0x921   : > { %1463 = vrot.lane.b32.xlu0 %v4166_v46, %s3566_s30 }
 0x926   : > { %1461 = vrot.lane.b32.xlu1 %v4164_v44, %s3566_s30 }
 0x998   : > { %v1673_v1 = vpop.xlane.xlu0 %1672 }
 0x999   : > { %v1683_v2 = vsub.f32 %v1667_v51, %v1673_v1 }
 0x99a   : > { %v1676_v3 = vpop.xlane.xlu1 %1675 }
 0x99b   : > { %v1687_v4 = vmul.f32 1.442695, %v1683_v2  ;;  %v1684_v5 = vsub.f32 %v1668_v57, %v1676_v3 }
 0x99c   : > { %v1464_v22 = vpop.permute.xlu0 %1463 }
 0x99d   : > { %3107 = vpow2.f32 %v1687_v4  ;;  %v1689_v6 = vmul.f32 1.442695, %v1684_v5 }
 0x99e   : > { %v1679_v7 = vpop.xlane.xlu1 %1678 }
 0x99f   : > { %3109 = vpow2.f32 %v1689_v6  ;;  %v1685_v8 = vsub.f32 %v1669_v61, %v1679_v7 }
 0x9a1   : > { %v1691_v9 = vmul.f32 1.442695, %v1685_v8 }
 0x9a2   : > { %v1682_v10 = vpop.xlane.xlu1 %1681 }
 0x9a3   : > { %3111 = vpow2.f32 %v1691_v9  ;;  %v1686_v13 = vsub.f32 %v1670_v63, %v1682_v10  ;;  %v3096_v63 = vld [vmem:[%s4108_s22] sm:$0xff]   ;;  %s4428_s22 = sld [smem:[#allocation23_spill]] }
 0x9a5   : > { %v1693_v14 = vmul.f32 1.442695, %v1686_v13 }
 0x9a6   : > { %v1462_v21 = vpop.permute.xlu1 %1461 }
 0x9a7   : > { %v3108_v15 = vpop.eup %3107  ;;  %3113 = vpow2.f32 %v1693_v14 }
 0x9a8   : > { %v1695_v46 = vsel %vm1032_vm2, %v3108_v15, 0.0 }
 0x9a9   : > { %v3110_v44 = vpop.eup %3109  ;;  %1696 = vadd.xlane.f32.xlu1 %v1695_v46  ;;  %p2756_p9 = scmp.ne.s32.totalorder %s4428_s22, 1 }
 0x9aa   : > { %v1698_v16 = vsel %vm1032_vm2, %v3110_v44, 0.0  ;;  %vm3568_vm8 = vmmov (!%p2756_p9), 0  }
 0x9ab   : > { %1699 = vadd.xlane.f32.xlu0 %v1698_v16 }
 0x9ad   : > { %v3112_v17 = vpop.eup %3111 }
 0x9ae   : > { %v1701_v18 = vsel %vm1032_vm2, %v3112_v17, 0.0 }
 0x9af   : > { %1702 = vadd.xlane.f32.xlu1 %v1701_v18 }
 0x9b1   : > { %v3114_v19 = vpop.eup %3113 }
 0x9b2   : > { %v1704_v20 = vsel %vm1032_vm2, %v3114_v19, 0.0 }
 0x9b3   : > { %1705 = vadd.xlane.f32.xlu0 %v1704_v20  ;;  %v3097_v20 = vld [vmem:[%s4121_s16] sm:$0xff]  }
 0x9e2   : > { %1467 = vxpose.xlu1.b32.start [1/2] (short) (narrow) %v1462_v21, 16  ;;  %v3098_v21 = vld [vmem:[%s4124_s20] sm:$0xff]  }
 0x9e6   : > { %1468 = vxpose.xlu1.b32.end [2/2] (short) (narrow) %v1464_v22, 16 }
 0xa36   : > { %v1697_v23 = vpop.xlane.xlu1 %1696 }
 0xa38   : > { %v1700_v29 = vpop.xlane.xlu0 %1699 }
 0xa39   : > { %3115 = vrcp.f32 %v1700_v29 }
 0xa3c   : > { %v1703_v24 = vpop.xlane.xlu1 %1702 }
 0xa40   : > { %v1706_v30 = vpop.xlane.xlu0 %1705 }
 0xa41   : > { %3117 = vrcp.f32 %v1706_v30 }
 0xa42   : > { %3119 = vrcp.f32 %v1697_v23 }
 0xa43   : > { %3121 = vrcp.f32 %v1703_v24  ;;  %v3116_v32 = vpop.eup %3115 }
 0xa44   : > { %v1710_v41 = vmul.f32 %v3116_v32, %v3110_v44  ;;  %v2741_v32 = vld [vmem:[%s769_s29] ss:$0 sm:$0xff]  ;;  %s3569_s29 = smov (!%p2756_p9), 112  }
 0xa4b   : > { %v3118_v33 = vpop.eup %3117 }
 0xa4c   : > { %v3120_v34 = vpop.eup %3119  ;;  %v1714_v42 = vmul.f32 %v3118_v33, %v3114_v19 }
 0xa4d   : > { %v3122_v38 = vpop.eup %3121  ;;  %v1708_v47 = vmul.f32 %v3120_v34, %v3108_v15 }
 0xa4e   : > { %v1712_v48 = vmul.f32 %v3122_v38, %v3112_v17  ;;  %v3100_v38 = vld [vmem:[%s4118_s11 + $0x8] sm:$0xff]  }
 0xa4f   : > { %v1715_v49 = vpack.c.bf16 %v1710_v41, %v1708_v47  ;;  %v2745_v41 = vld [vmem:[%s803_s23] ss:$0 sm:$0xff] }
 0xa50   : > { %v1716_v50 = vpack.c.bf16 %v1714_v42, %v1712_v48 }
 0xa62   : > { %v1483_v25 = vpop.trf.xlu1 }
 0xa66   : > { %v1484_v27 = vpop.trf.xlu1 }
 0xa67   : > { %v3073_v28 = vpack.i.bf16 %v1484_v27, %v1483_v25 }
 0xa69   : > { %3074 = vxpose.xlu0.b32.start.end [1/1] (short) (narrow) %v3073_v28, 16 }
 0xae9   : > { %v3075_v31 = vpop.trf.xlu0 }
 0xaea   : > { %v3079_v35 = vunpack.i.h.bf16 %v3075_v31  ;;  %v3076_v36 = vunpack.i.l.bf16 %v3075_v31 }
 0xaed   : > { %v3080_v37 = vpop.trf.xlu0 }
 0xaee   : > { %v3084_v39 = vunpack.i.h.bf16 %v3080_v37  ;;  %v3081_v40 = vunpack.i.l.bf16 %v3080_v37  ;;  %v3099_v37 = vld [vmem:[%s4118_s11] sm:$0xff]  }
 0xaf0   : > { %v1563_v43 = vpack.c.bf16 %v3081_v40, %v3076_v36  ;;  %v1564_v45 = vpack.c.bf16 %v3084_v39, %v3079_v35  ;;  %v3101_v39 = vld [vmem:[%s4118_s11 + $0x10] sm:$0xff]   ;;  %v3102_v40 = vld [vmem:[%s4118_s11 + $0x18] sm:$0xff]   ;;  %s4429_s11 = sld [smem:[#allocation35_spill]] (!%p2756_p9) }
 0xaf2   : > { %2841 = vmatpush3.bf16.msra.mxu1 %v1563_v43  ;;  %2847 = vmatpush3.bf16.msra.mxu0 %v1564_v45 }
 0xaf3   : > { %2852 = vmatprep.subr.bf16.mxu1 %v3562_v26  ;;  %2858 = vmatprep.subr.bf16.mxu0 %v3562_v26 }
 0xaf5   : > { %2843 = vmatmul.mubr.msk.bf16.vlgmr.msra.gmra.mrb[12].mxu1 %vm1032_vm2, %v1715_v49  ;;  %2849 = vmatmul.mubr.msk.bf16.vlgmr.msra.gmra.mrb[8].mxu0 %vm1032_vm2, %v1716_v50 }
 0xaf6   : > { %2854 = vmatprep.mubr.msk.bf16.mxu1 %vm3563_vm3, %v3562_v26  ;;  %2860 = vmatprep.mubr.msk.bf16.mxu0 %vm3563_vm3, %v3562_v26 }
 0xaf7   : > { %2853 = vmatpush3.bf16.msra.mxu1 %v3096_v63  ;;  %2859 = vmatpush3.bf16.msra.mxu0 %v3097_v20 }
 0xaf8   : > { %2864 = vmatprep.subr.bf16.mxu1 %v3562_v26  ;;  %2870 = vmatprep.subr.bf16.mxu0 %v3562_v26 }
 0xbc8   : > { %v1754_v51 = vpop.f32.mrb[12].mxu1  ;;  %v1798_v52 = vpop.f32.mrb[8].mxu0 }
 0xbc9   : > { %v3085_v53 = vpack.i.bf16 %v1798_v52, %v1754_v51  ;;  %v2844_v54 = vpop.f32.mrb[13].mxu1  ;;  %v2850_v55 = vpop.f32.mrb[9].mxu0 }
 0xbca   : > { %v1757_v56 = vpop.f32.mrb[14].mxu1  ;;  %v1801_v57 = vpop.f32.mrb[10].mxu0 }
 0xbcb   : > { %v3087_v58 = vpack.i.bf16 %v1801_v57, %v1757_v56  ;;  %v2851_v59 = vpop.f32.mrb[11].mxu0  ;;  %3086 = vxpose.xlu0.b32.start [1/2] (short) (narrow) %v3085_v53, 8  ;;  %v2845_v60 = vpop.f32.mrb[15].mxu1 }
 0xbcc   : > { %v2742_v59 = vld [vmem:[%s786_s2] ss:$0 sm:$0xff] }
 0xbcf   : > { %3088 = vxpose.xlu0.b32.end [2/2] (short) (narrow) %v3087_v58, 8 }
 0xc4b   : > { %v3089_v61 = vpop.trf.xlu0 }
 0xc4c   : > { %v3090_v62 = vunpack.i.l.bf16 %v3089_v61  ;;  %v3093_v0 = vunpack.i.h.bf16 %v3089_v61 }
 0xc4e   : > { %1869 = vxpose.xlu0.b32.start [1/2] (short) (narrow) %v3090_v62, 16 }
 0xc52   : > { %1870 = vxpose.xlu0.b32.end [2/2] (short) (narrow) %v3093_v0, 16 }
 0xcce   : > { %v1885_v1 = vpop.trf.xlu0 }
 0xcd2   : > { %v1886_v2 = vpop.trf.xlu0 }
 0xcd3   : > { %v1901_v3 = vpack.c.bf16 %v1886_v2, %v1885_v1 }
 0xcd5   : > { %2855 = vmatmul.mubr.msk.bf16.vlgmr.msra.gmra.mrb[16].mxu1 %vm1032_vm2, %v1901_v3 }
 0xcd6   : > { %2866 = vmatprep.mubr.msk.bf16.mxu1 %vm3563_vm3, %v3562_v26  ;;  %2865 = vmatpush3.bf16.msra.mxu1 %v3098_v21 }
 0xda8   : > { %v1947_v4 = vpop.f32.mrb[16].mxu1 }
 0xda9   : > { %v4225_v5 = vadd.f32 %v1947_v4, %v4129_v11  ;;  %v2856_v6 = vpop.f32.mrb[17].mxu1 }
 0xdaa   : > { %v1950_v7 = vpop.f32.mrb[18].mxu1 }
 0xdab   : > { %v4228_v8 = vadd.f32 %v1950_v7, %v4131_v12  ;;  %v2857_v9 = vpop.f32.mrb[19].mxu1  ;;  %v1957_v10 = vsel %vm1032_vm2, %v4225_v5, 0.0  ;;  %v2755_v7 = vld [vmem:[%s811_s5] ss:$0 sm:$0xff] }
 0xdac   : > { %1958 = vadd.xlane.f32.xlu1 %v1957_v10 }
 0xdad   : > { %v1960_v13 = vsel %vm1032_vm2, %v4228_v8, 0.0 }
 0xdae   : > { %1961 = vadd.xlane.f32.xlu0 %v1960_v13 }
 0xe39   : > { %v1959_v14 = vpop.xlane.xlu1 %1958 }
 0xe3a   : > { %v1963_v15 = vmul.f32 0.0625, %v1959_v14 }
 0xe3b   : > { %v1962_v11 = vpop.xlane.xlu0 %1961 }
 0xe3c   : > { %v1965_v46 = vsub.f32 %v4225_v5, %v1963_v15  ;;  %v1964_v44 = vmul.f32 0.0625, %v1962_v11 }
 0xe3e   : > { %v1966_v12 = vsub.f32 %v4228_v8, %v1964_v44  ;;  %v1967_v16 = vmul.f32 %v1965_v46, %v1965_v46  ;;  %v3135_v44 = vld [vmem:[#allocation5] sm:$0xff] (!%p2756_p9)  }
 0xe40   : > { %v1969_v17 = vsel %vm1032_vm2, %v1967_v16, 0.0  ;;  %v1968_v18 = vmul.f32 %v1966_v12, %v1966_v12 }
 0xe41   : > { %1970 = vadd.xlane.f32.xlu1 %v1969_v17 }
 0xe42   : > { %v1972_v19 = vsel %vm1032_vm2, %v1968_v18, 0.0 }
 0xe45   : > { %1973 = vadd.xlane.f32.xlu1 %v1972_v19 }
 0xece   : > { %v1971_v22 = vpop.xlane.xlu1 %1970 }
 0xecf   : > { %v1975_v23 = vmul.f32 0.0625, %v1971_v22 }
 0xed1   : > { %v1977_v24 = vadd.f32 1e-05, %v1975_v23  ;;  %v2759_v23 = vld [vmem:[#allocation7] ss:$0 sm:$0xff] (!%p2756_p9) }
 0xed2   : > { %v1974_v25 = vpop.xlane.xlu1 %1973 }
 0xed3   : > { %3123 = vrsqrt.f32 %v1977_v24  ;;  %v1976_v27 = vmul.f32 0.0625, %v1974_v25 }
 0xed5   : > { %v1978_v28 = vadd.f32 1e-05, %v1976_v27 }
 0xed7   : > { %3125 = vrsqrt.f32 %v1978_v28 }
 0xedd   : > { %v3124_v29 = vpop.eup %3123 }
 0xede   : > { %v1981_v30 = vmul.f32 %v3124_v29, %v1965_v46 }
 0xee0   : > { %v1989_v35 = vmul.f32 %v2741_v32, %v1981_v30 }
 0xee1   : > { %v3126_v31 = vpop.eup %3125 }
 0xee2   : > { %v1982_v33 = vmul.f32 %v3126_v31, %v1966_v12  ;;  %v3567_v12 = vmov (!%p2756_p9), 0.0  }
 0xee3   : > { %2888 = vmatprep.subr.bf16.mxu1 (!%p2756_p9), %v3567_v12 }
 0xee4   : > { %v1990_v34 = vmul.f32 %v2741_v32, %v1982_v33 }
 0xee6   : > { %v1991_v36 = vpack.c.bf16 %v1990_v34, %v1989_v35 }
 0xee8   : > { %2861 = vmatmul.mubr.msk.bf16.vlgmr.msra.gmra.mrb[12].mxu0 %vm1032_vm2, %v1991_v36  ;;  %2867 = vmatmul.mubr.msk.bf16.vlgmr.msra.gmra.mrb[20].mxu1 %vm1032_vm2, %v1991_v36 }
 0xee9   : > { %2878 = vmatprep.mubr.msk.bf16.mxu0 %vm3563_vm3, %v3562_v26  ;;  %2871 = vmatpush3.bf16.msra.mxu0 %v3099_v37 }
 0xeea   : > { %2872 = vmatprep.subr.bf16.mxu0 %v3562_v26  ;;  %2890 = vmatprep.mubr.msk.bf16.mxu1 (!%p2756_p9), %vm3568_vm8, %v3567_v12 }
 0xeed   : > { %2873 = vmatpush3.bf16.msra.mxu0 %v3100_v38 }
 0xeee   : > { %2874 = vmatprep.subr.bf16.mxu0 %v3562_v26 }
 0xef1   : > { %2875 = vmatpush3.bf16.msra.mxu0 %v3101_v39 }
 0xef2   : > { %2876 = vmatprep.subr.bf16.mxu0 %v3562_v26 }
 0xef5   : > { %2877 = vmatpush3.bf16.msra.mxu0 %v3102_v40 }
 0xef6   : > { %2882 = vmatprep.subr.bf16.mxu0 (!%p2756_p9), %v3567_v12 }
 0xfbb   : > { %v2044_v42 = vpop.f32.mrb[12].mxu0  ;;  %v2100_v43 = vpop.f32.mrb[20].mxu1 }
 0xfbc   : > { %v2101_v45 = vadd.f32 %v2745_v41, %v2100_v43  ;;  %v2862_v47 = vpop.f32.mrb[13].mxu0  ;;  %v2868_v48 = vpop.f32.mrb[21].mxu1  ;;  %v2045_v61 = vadd.f32 %v2742_v59, %v2044_v42 }
 0xfbd   : > { %v2047_v49 = vpop.f32.mrb[14].mxu0  ;;  %v2103_v50 = vpop.f32.mrb[22].mxu1 }
 0xfbe   : > { %v2748_v51 = vmul.f32 -1.442695, %v2101_v45  ;;  %v2104_v52 = vadd.f32 %v2745_v41, %v2103_v50  ;;  %v2863_v53 = vpop.f32.mrb[15].mxu0  ;;  %v2869_v54 = vpop.f32.mrb[23].mxu1  ;;  %v2048_v1 = vadd.f32 %v2742_v59, %v2047_v49 }
 0xfc0   : > { %3127 = vpow2.f32 %v2748_v51  ;;  %v2749_v55 = vmul.f32 -1.442695, %v2104_v52 }
 0xfc2   : > { %3129 = vpow2.f32 %v2749_v55 }
 0xfca   : > { %v3128_v26 = vpop.eup %3127 }
 0xfcb   : > { %v2113_v56 = vadd.f32 1.0, %v3128_v26 }
 0xfcc   : > { %v3130_v57 = vpop.eup %3129 }
 0xfcd   : > { %3131 = vrcp.f32 %v2113_v56  ;;  %v2114_v58 = vadd.f32 1.0, %v3130_v57 }
 0xfcf   : > { %3133 = vrcp.f32 %v2114_v58 }
 0xfd7   : > { %v3132_v60 = vpop.eup %3131 }
 0xfd8   : > { %v2119_v62 = vmul.f32 %v3132_v60, %v2101_v45 }
 0xfd9   : > { %v3134_v63 = vpop.eup %3133 }
 0xfda   : > { %v2121_v0 = vmul.f32 %v2119_v62, %v2045_v61  ;;  %v2120_v2 = vmul.f32 %v3134_v63, %v2104_v52 }
 0xfdc   : > { %v2122_v3 = vmul.f32 %v2120_v2, %v2048_v1 }
 0xfde   : > { %v2123_v4 = vpack.c.bf16 %v2122_v3, %v2121_v0 }
 0xfe0   : > { %2879 = vmatmul.mubr.msk.bf16.vlgmr.msra.gmra.mrb[16].mxu0 %vm2156_vm7, %v2123_v4 }
 0xfe1   : > { %2883 = vmatpush3.bf16.msra.mxu0 (!%p2756_p9), %v3135_v44  ;;  %2884 = vmatprep.mubr.msk.bf16.mxu0 (!%p2756_p9), %vm3568_vm8, %v3567_v12 }
0x10b3   : > { %v2194_v6 = vpop.f32.mrb[16].mxu0 }
0x10b4   : > { %v2201_v9 = vadd.f32 %v2194_v6, %v4225_v5  ;;  %v2880_v10 = vpop.f32.mrb[17].mxu0  ;;  %2217 = sbr.rel (%p2756_p9) target bundleno = 5001 (0x1389), region = 144 }
0x10b5   : > { %v2197_v13 = vpop.f32.mrb[18].mxu0 }
0x10b6   : > { %v2210_v14 = vadd.f32 %v2755_v7, %v2201_v9  ;;  %v2202_v15 = vadd.f32 %v2197_v13, %v4228_v8  ;;  %v2881_v11 = vpop.f32.mrb[19].mxu0  ;;  %v3136_v8 = vld [vmem:[%s4429_s11] sm:$0xff] (!%p2756_p9)  }
0x10b7   : > { %2889 = vmatpush3.bf16.msra.mxu1 (!%p2756_p9), %v3136_v8 }
0x10b8   : > { %2212 = vst.msk [vmem:[#allocation2] sm:$0xff] %vm1032_vm2, %v2210_v14  ;;  %v2211_v46 = vadd.f32 %v2755_v7, %v2202_v15 }
0x10ba   : > { %2213 = vst.msk [vmem:[#allocation2 + $0x8] sm:$0xff] %vm1032_vm2, %v2211_v46 }
0x10bf   : > { %v2218_v16 = vld [vmem:[#allocation2] sm:$0xff] }
0x10c1   : > { %v2219_v17 = vld [vmem:[#allocation2 + $0x8] sm:$0xff] }
0x10c2   : > { %v2220_v5 = vpack.c.bf16 %v2219_v17, %v2218_v16 }
0x10c4   : > { %2885 = vmatmul.mubr.msk.bf16.vlgmr.msra.gmra.mrb[0].mxu0 %vm1032_vm2, %v2220_v5 }
0x1197   : > { %v2266_v18 = vpop.f32.mrb[0].mxu0 }
0x1198   : > { %v2886_v19 = vpop.f32.mrb[1].mxu0 }
0x1199   : > { %v2269_v20 = vpop.f32.mrb[2].mxu0 }
0x119a   : > { %v2273_v21 = vpack.c.bf16 %v2269_v20, %v2266_v18  ;;  %v2887_v22 = vpop.f32.mrb[3].mxu0 }
0x119c   : > { %2891 = vmatmul.mubr.msk.bf16.vlgmr.msra.gmra.mrb[0].mxu1 %vm1032_vm2, %v2273_v21 }
0x126f   : > { %v2326_v24 = vpop.f32.mrb[0].mxu1 }
0x1270   : > { %v2327_v25 = vadd.f32 %v2759_v23, %v2326_v24  ;;  %v2892_v27 = vpop.f32.mrb[1].mxu1 }
0x1271   : > { %v2329_v28 = vpop.f32.mrb[2].mxu1 }
0x1272   : > { %v2333_v29 = vmul.f32 1.442695, %v2327_v25  ;;  %v2330_v30 = vadd.f32 %v2759_v23, %v2329_v28  ;;  %2341 = vxpose.xlu1.b32.start [1/2] (short) (narrow) %v2327_v25, 16  ;;  %v2893_v31 = vpop.f32.mrb[3].mxu1 }
0x1274   : > { %3137 = vpow2.f32 %v2333_v29  ;;  %v2335_v32 = vmul.f32 1.442695, %v2330_v30 }
0x1276   : > { %3139 = vpow2.f32 %v2335_v32  ;;  %2342 = vxpose.xlu1.b32.end [2/2] (short) (narrow) %v2330_v30, 16 }
0x127e   : > { %v3138_v33 = vpop.eup %3137 }
0x127f   : > { %v2762_v34 = vadd.f32 -0.01, %v3138_v33 }
0x1280   : > { %v3140_v35 = vpop.eup %3139 }
0x1281   : > { %v2763_v36 = vadd.f32 -0.01, %v3140_v35  ;;  %v2339_v37 = vmax.f32 %v2762_v34, 1e-06 }
0x1283   : > { %v2340_v38 = vmax.f32 %v2763_v36, 1e-06  ;;  %3141 = vlog2.f32 %v2339_v37 }
0x1285   : > { %3143 = vlog2.f32 %v2340_v38 }
0x128d   : > { %v3142_v39 = vpop.eup %3141 }
0x128e   : > { %v2376_v40 = vmul.f32 0.6931472, %v3142_v39 }
0x128f   : > { %v3144_v41 = vpop.eup %3143 }
0x1290   : > { %2381 = vrot.lane.b32.xlu0 %v2376_v40, %s3569_s29  ;;  %v2378_v42 = vmul.f32 0.6931472, %v3144_v41 }
0x1294   : > { %2383 = vrot.lane.b32.xlu0 %v2378_v42, %s3569_s29 }
0x12f2   : > { %v2357_v43 = vpop.trf.xlu1 }
0x12f3   : > { %2373 = vst.msk [vmem:[%s4113_s8] sm:$0xff] %vm1032_vm2, %v2357_v43 }
0x12f6   : > { %v2358_v47 = vpop.trf.xlu1 }
0x12f7   : > { %2374 = vst.msk [vmem:[%s4113_s8 + $0x8] sm:$0xff] %vm1032_vm2, %v2358_v47 }
0x1302   : > { %v2382_v45 = vpop.permute.xlu0 %2381 }
0x1303   : > { %2387 = vxpose.xlu0.b32.start [1/2] (short) (narrow) %v2382_v45, 16 }
0x1306   : > { %v2384_v48 = vpop.permute.xlu0 %2383 }
0x1307   : > { %2388 = vxpose.xlu0.b32.end [2/2] (short) (narrow) %v2384_v48, 16 }
0x1383   : > { %v2403_v49 = vpop.trf.xlu0 }
0x1384   : > { %2419 = vst.msk [vmem:[%s4113_s8 + $0x10] sm:$0xff] %vm1032_vm2, %v2403_v49 }
0x1387   : > { %v2404_v50 = vpop.trf.xlu0 }
0x1388   : > { %2420 = vst.msk [vmem:[%s4113_s8 + $0x18] sm:$0xff] %vm1032_vm2, %v2404_v50 }
0x1389 PF: > { %s4430_s16 = sld [smem:[#allocation26_spill]]  ;;  %s4431_s27 = sld [smem:[#allocation21_spill]] }
0x138a   : > { %s4432_s28 = sld [smem:[#allocation22_spill]]  ;;  %s4433_s29 = sld [smem:[#allocation31_spill]] }
0x138b   : > { %s4434_s0 = sld [smem:[#allocation25_spill]]  ;;  %s4435_s2 = sld [smem:[#allocation29_spill]] }
0x138c   : > { %s4436_s1 = sld [smem:[#allocation30_spill]]  ;;  %s4437_s30 = smov %s3537_s19 }
0x138f   : > { %s31_s20 = sadd.s32 1, %s4430_s16  }
0x1390   : > { %p28_p6 = scmp.ge.s32.totalorder %s31_s20, 6  }
0x1391   : > { %s4438_s19 = smov %s4435_s2 }
0x1392   :  { %30 = sbr.rel (!%p28_p6) target bundleno = 22 (0x16), region = 233 }
0x1399   :  { %2442 = vsyncpa [#allocation4], 1 }
0x139a   :  { %2444 = vsyncpa [#allocation4 + $0x1], 1 }
0x139b   :  { %2445 = vsyncpa [#allocation6], 1 }
0x139c   :  { %2446 = vsyncpa [#allocation9], 1 }

</bundles_post_ra>
